<compile_context>
chip_gen: v5e
topology: v5e:2x2
jax: 0.10.0
libtpu: 0.0.40
codegen_flags: <defaults>
</compile_context>

<pallas_src>
import jax
import jax.numpy as jnp
from jax.experimental import pallas as pl
from jax.experimental.pallas import tpu as pltpu


# ----------------------------- fused Pallas kernel -----------------------------

def fused_forward_kernel(patchT_ref, wconvT_ref, bconv_ref, amat2_ref, sel_ref,
                         x_ref, wih_ref, whh_ref, blstm_ref, lenb_ref,
                         w1v_ref, w1t_ref, b1_ref, w2_ref, b2_ref, out_ref):
    B = out_ref.shape[0]
    HW = amat2_ref.shape[0]
    Hl = whh_ref.shape[0]
    T = x_ref.shape[0] // B

    # ---- visual branch: conv3x3 (im2col matmul, batched over B) + ReLU + pool --
    # One MXU call covers all batches: (Cout, 9Cin) @ (9Cin, B*HW).  Pooling is
    # per-batch on 128-aligned lane slices; the channel-tiled pooling matrix +
    # select mask + sublane sum emits each batch's visual feature directly as a
    # lane-dense (1, Cout*P*P) row in nn.Flatten(NCHW) order (no transpose).
    conv_all = jnp.dot(wconvT_ref[...], patchT_ref[...],
                       preferred_element_type=jnp.float32)       # (Cout, B*HW)
    conv_all = jnp.maximum(conv_all + bconv_ref[...], 0.0)
    amat2 = amat2_ref[...]                                        # (HW, Cout*PP) bf16
    sel = sel_ref[...]                                            # (Cout, Cout*PP) f32
    vis_rows = []
    for b in range(B):                                            # B small & static
        convT_b = conv_all[:, b * HW:(b + 1) * HW]                # lane slice
        m = jnp.dot(convT_b.astype(amat2.dtype), amat2,
                    preferred_element_type=jnp.float32)           # (Cout, Cout*PP)
        vis_rows.append(jnp.sum(m * sel, axis=0, keepdims=True))
    vis = jnp.concatenate(vis_rows, axis=0)                       # (B, Cout*PP) f32
    # TODO(synk): at larger HW/Cout replace amat2+sel (mostly-zero matrix) with
    #   convT @ amatT plus a lane-placement (pltpu.roll) pass to save VMEM/MXU.

    # ---- question branch: single-layer LSTM with pack_padded semantics ----
    # Gate columns are pre-reordered to [i, f, o, g]: one sigmoid over the full
    # gates vreg + one tanh slice per step.  Input projection hoisted.
    gin = jnp.dot(x_ref[...], wih_ref[...],
                  preferred_element_type=jnp.float32) + blstm_ref[...]  # (T*B, 4H)
    whh = whh_ref[...]                                            # (Hl, 4Hl) bf16
    len_b = lenb_ref[...]                                         # (B, Hl) int32
    h = jnp.zeros((B, Hl), jnp.float32)
    c = jnp.zeros((B, Hl), jnp.float32)
    # TODO(synk): for large T switch to lax.fori_loop(unroll=2-4) with
    #   pl.ds(t*B, B) slices; benchmark replacing the tiny h @ W_hh MXU dot with
    #   a VPU broadcast-FMA to dodge the MRF-pop latency on the serial chain.
    for t in range(T):                                            # h/c stay in vregs
        gates = gin[t * B:(t + 1) * B, :] + jnp.dot(
            h.astype(whh.dtype), whh, preferred_element_type=jnp.float32)
        sig = jax.nn.sigmoid(gates)                               # i|f|o (+ extra lanes)
        g_g = jnp.tanh(gates[:, 3 * Hl:4 * Hl])
        c_new = sig[:, Hl:2 * Hl] * c + sig[:, 0:Hl] * g_g
        h_new = sig[:, 2 * Hl:3 * Hl] * jnp.tanh(c_new)
        mask = t < len_b                                          # compare vs immediate
        h = jnp.where(mask, h_new, h)                             # freeze past seq len
        c = jnp.where(mask, c_new, c)

    # ---- dropout(identity) + concat + MLP + output linear ----
    # concat([vis, txt]) @ W1 == vis @ W1[:Fv] + txt @ W1[Fv:]
    h1 = (jnp.dot(vis.astype(w1v_ref.dtype), w1v_ref[...],
                  preferred_element_type=jnp.float32)
          + jnp.dot(h.astype(w1t_ref.dtype), w1t_ref[...],
                    preferred_element_type=jnp.float32)
          + b1_ref[...])
    h1 = jnp.maximum(h1, 0.0)
    out_ref[...] = (jnp.dot(h1.astype(w2_ref.dtype), w2_ref[...],
                            preferred_element_type=jnp.float32) + b2_ref[...])


# ----------------------------- pallas_call wrapper -----------------------------

def _full_spec(shape):
    nd = len(shape)
    return pl.BlockSpec(shape, lambda i, _nd=nd: (0,) * _nd)


def _reorder_gates_ifgo_to_ifog(w, H):
    """Rows in PyTorch LSTM order [i, f, g, o] -> [i, f, o, g]."""
    return jnp.concatenate([w[0:H], w[H:2 * H], w[3 * H:4 * H], w[2 * H:3 * H]],
                           axis=0)


def lstm_cnn_baseline_forward(params, simulations, questions, lengths, pool_size):
    B, Cin, H, W = simulations.shape
    P = pool_size
    cdt = jnp.bfloat16

    # --- frame-encoder glue: im2col patches, batch folded into the lane axis
    x = jnp.transpose(simulations, (0, 2, 3, 1))                    # NCHW -> NHWC
    xp = jnp.pad(x, ((0, 0), (1, 1), (1, 1), (0, 0)))
    patches = jnp.concatenate(
        [xp[:, dy:dy + H, dx:dx + W, :] for dy in range(3) for dx in range(3)],
        axis=-1).reshape(B, H * W, 9 * Cin)
    # (9Cin, B*HW): one conv matmul for all batches inside the kernel.
    patchT_all = jnp.transpose(patches, (2, 0, 1)).reshape(9 * Cin, B * H * W).astype(cdt)
    # TODO(synk): at production resolutions build the 9 shifted views inside the
    #   kernel from a padded NHWC tile (single DMA) instead of im2col in HBM.

    Cout = params["conv_w"].shape[0]
    wmat = jnp.transpose(params["conv_w"], (2, 3, 1, 0)).reshape(9 * Cin, Cout)
    wconvT = wmat.T.astype(cdt)                                     # (Cout, 9Cin)
    bconv = params["conv_b"].reshape(Cout, 1).astype(jnp.float32)

    # adaptive avg pool as a matmul (H, W divisible by P -> uniform bins),
    # tiled over channels so the pooled output lands on 128 lanes directly.
    hb, wb = H // P, W // P
    ys = jnp.arange(H) // hb
    xs = jnp.arange(W) // wb
    pool_idx = (ys[:, None] * P + xs[None, :]).reshape(-1)                  # (HW,)
    amatT = jax.nn.one_hot(pool_idx, P * P, dtype=jnp.float32) / (hb * wb)  # (HW, PP)
    amat2 = jnp.tile(amatT, (1, Cout)).astype(cdt)                          # (HW, Cout*PP)
    sel = jnp.repeat(jnp.eye(Cout, dtype=jnp.float32), P * P, axis=1)       # (Cout, Cout*PP)

    # --- question-encoder glue: embedding gather + time-major flat layout,
    #     LSTM gates reordered [i,f,g,o] -> [i,f,o,g] for a fused sigmoid.
    Hl = params["w_hh"].shape[1]
    x_emb = params["emb"][questions]                                # (B, T, E)
    Tq = x_emb.shape[1]
    x2d = jnp.transpose(x_emb, (1, 0, 2)).reshape(Tq * B, -1).astype(cdt)   # (T*B, E)
    w_ih_r = _reorder_gates_ifgo_to_ifog(params["w_ih"], Hl)
    w_hh_r = _reorder_gates_ifgo_to_ifog(params["w_hh"], Hl)
    b_r = _reorder_gates_ifgo_to_ifog(params["b_ih"] + params["b_hh"], Hl)
    wih = w_ih_r.T.astype(cdt)                                      # (E, 4H)
    whh = w_hh_r.T.astype(cdt)                                      # (H, 4H)
    blstm = b_r.reshape(1, -1).astype(jnp.float32)
    # lengths pre-broadcast to (B, Hl): per-step mask is a compare-with-immediate.
    len_b = jnp.broadcast_to(lengths.reshape(B, 1), (B, Hl)).astype(jnp.int32)

    # --- MLP / output-linear params: concat folded by splitting W1; pad output
    Fv = Cout * P * P
    w1v = params["mlp_w"][:Fv].astype(cdt)                          # (Fv, Hm)
    w1t = params["mlp_w"][Fv:].astype(cdt)                          # (Hl, Hm)
    b1 = params["mlp_b"].reshape(1, -1).astype(jnp.float32)
    O = params["lin_w"].shape[1]
    Opad = ((O + 127) // 128) * 128
    w2 = jnp.pad(params["lin_w"], ((0, 0), (0, Opad - O))).astype(cdt)
    b2 = jnp.pad(params["lin_b"], (0, Opad - O)).reshape(1, Opad).astype(jnp.float32)

    args = (patchT_all, wconvT, bconv, amat2, sel,
            x2d, wih, whh, blstm, len_b,
            w1v, w1t, b1, w2, b2)

    out = pl.pallas_call(
        fused_forward_kernel,
        out_shape=jax.ShapeDtypeStruct((B, Opad), jnp.float32),
        grid=(1,),
        in_specs=[_full_spec(a.shape) for a in args],
        out_specs=_full_spec((B, Opad)),
        compiler_params=pltpu.CompilerParams(dimension_semantics=("arbitrary",)),
    )(*args)
    # TODO(synk): at larger B add a leading "parallel" batch grid axis (v7x
    #   megacore) with real BlockSpec tiles over patchT_all / x2d for DMA
    #   pipelining, and re-derive tile sizes against v7x's 64 MiB VMEM.
    return out[:, :O]


# ----------------------------- main -----------------------------

if __name__ == "__main__":
    B, Cin, H, W = 2, 4, 16, 16       # simulations (NCHW)
    P = 4                             # pool_size
    Cout = 8                          # frame encoder out_channels
    vocab, T, E, Hl = 32, 8, 16, 32   # question encoder
    mlp_hidden, out_size = 32, 2
    F = Cout * P * P + Hl             # mlp input_size (visual + textual)

    key = jax.random.PRNGKey(0)
    ks = jax.random.split(key, 14)

    simulations = jax.random.normal(ks[0], (B, Cin, H, W), jnp.float32)
    questions = jax.random.randint(ks[1], (B, T), 0, vocab, dtype=jnp.int32)
    lengths = jnp.array([T, 5], dtype=jnp.int32)

    params = {
        "conv_w": 0.1 * jax.random.normal(ks[2], (Cout, Cin, 3, 3), jnp.float32),
        "conv_b": 0.1 * jax.random.normal(ks[3], (Cout,), jnp.float32),
        "emb":    0.1 * jax.random.normal(ks[4], (vocab, E), jnp.float32),
        "w_ih":   0.1 * jax.random.normal(ks[5], (4 * Hl, E), jnp.float32),
        "w_hh":   0.1 * jax.random.normal(ks[6], (4 * Hl, Hl), jnp.float32),
        "b_ih":   0.1 * jax.random.normal(ks[7], (4 * Hl,), jnp.float32),
        "b_hh":   0.1 * jax.random.normal(ks[8], (4 * Hl,), jnp.float32),
        "mlp_w":  0.1 * jax.random.normal(ks[9], (F, mlp_hidden), jnp.float32),
        "mlp_b":  0.1 * jax.random.normal(ks[10], (mlp_hidden,), jnp.float32),
        "lin_w":  0.1 * jax.random.normal(ks[11], (mlp_hidden, out_size), jnp.float32),
        "lin_b":  0.1 * jax.random.normal(ks[12], (out_size,), jnp.float32),
    }

    out = lstm_cnn_baseline_forward(params, simulations, questions, lengths, P)
    jax.block_until_ready(out)
    assert out.shape == (B, out_size)
    print("KERNEL_OK")
</pallas_src>

<mosaic_0001>
module attributes {stable_mosaic.version = 11 : i64} {
  func.func @fused_forward_kernel(%arg0: i32, %arg1: memref<36x512xbf16, #tpu.memory_space<vmem>>, %arg2: memref<8x36xbf16, #tpu.memory_space<vmem>>, %arg3: memref<8x1xf32, #tpu.memory_space<vmem>>, %arg4: memref<256x128xbf16, #tpu.memory_space<vmem>>, %arg5: memref<8x128xf32, #tpu.memory_space<vmem>>, %arg6: memref<16x16xbf16, #tpu.memory_space<vmem>>, %arg7: memref<16x128xbf16, #tpu.memory_space<vmem>>, %arg8: memref<32x128xbf16, #tpu.memory_space<vmem>>, %arg9: memref<1x128xf32, #tpu.memory_space<vmem>>, %arg10: memref<2x32xi32, #tpu.memory_space<vmem>>, %arg11: memref<128x32xbf16, #tpu.memory_space<vmem>>, %arg12: memref<32x32xbf16, #tpu.memory_space<vmem>>, %arg13: memref<1x32xf32, #tpu.memory_space<vmem>>, %arg14: memref<32x128xbf16, #tpu.memory_space<vmem>>, %arg15: memref<1x128xf32, #tpu.memory_space<vmem>>, %arg16: memref<2x128xf32, #tpu.memory_space<vmem>>) attributes {dimension_semantics = [#tpu.dimension_semantics<arbitrary>], iteration_bounds = array<i64: 1>, scalar_prefetch = 0 : i64, scratch_operands = 0 : i64, tpu.core_type = #tpu.core_type<tc>, window_params = [{pipeline_mode = #tpu.pipeline_mode<synchronous>, transform_indices = @transform_0, window_bounds = array<i64: 36, 512>}, {pipeline_mode = #tpu.pipeline_mode<synchronous>, transform_indices = @transform_1, window_bounds = array<i64: 8, 36>}, {pipeline_mode = #tpu.pipeline_mode<synchronous>, transform_indices = @transform_2, window_bounds = array<i64: 8, 1>}, {pipeline_mode = #tpu.pipeline_mode<synchronous>, transform_indices = @transform_3, window_bounds = array<i64: 256, 128>}, {pipeline_mode = #tpu.pipeline_mode<synchronous>, transform_indices = @transform_4, window_bounds = array<i64: 8, 128>}, {pipeline_mode = #tpu.pipeline_mode<synchronous>, transform_indices = @transform_5, window_bounds = array<i64: 16, 16>}, {pipeline_mode = #tpu.pipeline_mode<synchronous>, transform_indices = @transform_6, window_bounds = array<i64: 16, 128>}, {pipeline_mode = #tpu.pipeline_mode<synchronous>, transform_indices = @transform_7, window_bounds = array<i64: 32, 128>}, {pipeline_mode = #tpu.pipeline_mode<synchronous>, transform_indices = @transform_8, window_bounds = array<i64: 1, 128>}, {pipeline_mode = #tpu.pipeline_mode<synchronous>, transform_indices = @transform_9, window_bounds = array<i64: 2, 32>}, {pipeline_mode = #tpu.pipeline_mode<synchronous>, transform_indices = @transform_10, window_bounds = array<i64: 128, 32>}, {pipeline_mode = #tpu.pipeline_mode<synchronous>, transform_indices = @transform_11, window_bounds = array<i64: 32, 32>}, {pipeline_mode = #tpu.pipeline_mode<synchronous>, transform_indices = @transform_12, window_bounds = array<i64: 1, 32>}, {pipeline_mode = #tpu.pipeline_mode<synchronous>, transform_indices = @transform_13, window_bounds = array<i64: 32, 128>}, {pipeline_mode = #tpu.pipeline_mode<synchronous>, transform_indices = @transform_14, window_bounds = array<i64: 1, 128>}, {pipeline_mode = #tpu.pipeline_mode<synchronous>, transform_indices = @transform_15, window_bounds = array<i64: 2, 128>}]} {
    %c0 = arith.constant 0 : index
    %c0_0 = arith.constant 0 : index
    %0 = vector.load %arg2[%c0, %c0_0] : memref<8x36xbf16, #tpu.memory_space<vmem>>, vector<8x36xbf16>
    %c0_1 = arith.constant 0 : index
    %c0_2 = arith.constant 0 : index
    %1 = vector.load %arg1[%c0_1, %c0_2] : memref<36x512xbf16, #tpu.memory_space<vmem>>, vector<36x512xbf16>
    %cst = arith.constant dense<0.000000e+00> : vector<8x512xf32>
    %2 = tpu.matmul %0, %1, %cst {dimension_numbers = #tpu.dot_dimension_numbers<[1], [0], [0], [1], [0, 0, 1, 1], [], []>} : vector<8x36xbf16>, vector<36x512xbf16>, vector<8x512xf32> -> vector<8x512xf32>
    %c0_3 = arith.constant 0 : index
    %c0_4 = arith.constant 0 : index
    %3 = vector.load %arg3[%c0_3, %c0_4] : memref<8x1xf32, #tpu.memory_space<vmem>>, vector<8x1xf32>
    %4 = vector.broadcast %3 : vector<8x1xf32> to vector<8x512xf32>
    %5 = arith.addf %2, %4 : vector<8x512xf32>
    %cst_5 = arith.constant 0.000000e+00 : f32
    %6 = vector.broadcast %cst_5 : f32 to vector<8x512xf32>
    %7 = arith.maximumf %5, %6 : vector<8x512xf32>
    %c0_6 = arith.constant 0 : index
    %c0_7 = arith.constant 0 : index
    %8 = vector.load %arg4[%c0_6, %c0_7] : memref<256x128xbf16, #tpu.memory_space<vmem>>, vector<256x128xbf16>
    %c0_8 = arith.constant 0 : index
    %c0_9 = arith.constant 0 : index
    %9 = vector.load %arg5[%c0_8, %c0_9] : memref<8x128xf32, #tpu.memory_space<vmem>>, vector<8x128xf32>
    %10 = vector.extract_strided_slice %7 {offsets = [0, 0], sizes = [8, 256], strides = [1, 1]} : vector<8x512xf32> to vector<8x256xf32>
    %11 = arith.truncf %10 : vector<8x256xf32> to vector<8x256xbf16>
    %cst_10 = arith.constant dense<0.000000e+00> : vector<8x128xf32>
    %12 = tpu.matmul %11, %8, %cst_10 {dimension_numbers = #tpu.dot_dimension_numbers<[1], [0], [0], [1], [0, 0, 1, 1], [], []>} : vector<8x256xbf16>, vector<256x128xbf16>, vector<8x128xf32> -> vector<8x128xf32>
    %13 = arith.mulf %12, %9 : vector<8x128xf32>
    %cst_11 = arith.constant dense<0.000000e+00> : vector<128xf32>
    %14 = vector.multi_reduction <add>, %13, %cst_11 [0] : vector<8x128xf32> to vector<128xf32>
    %15 = vector.shape_cast %14 : vector<128xf32> to vector<1x128xf32>
    %16 = vector.extract_strided_slice %7 {offsets = [0, 256], sizes = [8, 256], strides = [1, 1]} : vector<8x512xf32> to vector<8x256xf32>
    %17 = arith.truncf %16 : vector<8x256xf32> to vector<8x256xbf16>
    %cst_12 = arith.constant dense<0.000000e+00> : vector<8x128xf32>
    %18 = tpu.matmul %17, %8, %cst_12 {dimension_numbers = #tpu.dot_dimension_numbers<[1], [0], [0], [1], [0, 0, 1, 1], [], []>} : vector<8x256xbf16>, vector<256x128xbf16>, vector<8x128xf32> -> vector<8x128xf32>
    %19 = arith.mulf %18, %9 : vector<8x128xf32>
    %cst_13 = arith.constant dense<0.000000e+00> : vector<128xf32>
    %20 = vector.multi_reduction <add>, %19, %cst_13 [0] : vector<8x128xf32> to vector<128xf32>
    %21 = vector.shape_cast %20 : vector<128xf32> to vector<1x128xf32>
    %22 = tpu.concatenate %15, %21 in 0 : vector<1x128xf32>, vector<1x128xf32> -> vector<2x128xf32>
    %c0_14 = arith.constant 0 : index
    %c0_15 = arith.constant 0 : index
    %23 = vector.load %arg6[%c0_14, %c0_15] : memref<16x16xbf16, #tpu.memory_space<vmem>>, vector<16x16xbf16>
    %c0_16 = arith.constant 0 : index
    %c0_17 = arith.constant 0 : index
    %24 = vector.load %arg7[%c0_16, %c0_17] : memref<16x128xbf16, #tpu.memory_space<vmem>>, vector<16x128xbf16>
    %cst_18 = arith.constant dense<0.000000e+00> : vector<16x128xf32>
    %25 = tpu.matmul %23, %24, %cst_18 {dimension_numbers = #tpu.dot_dimension_numbers<[1], [0], [0], [1], [0, 0, 1, 1], [], []>} : vector<16x16xbf16>, vector<16x128xbf16>, vector<16x128xf32> -> vector<16x128xf32>
    %c0_19 = arith.constant 0 : index
    %c0_20 = arith.constant 0 : index
    %26 = vector.load %arg9[%c0_19, %c0_20] : memref<1x128xf32, #tpu.memory_space<vmem>>, vector<1x128xf32>
    %27 = vector.broadcast %26 : vector<1x128xf32> to vector<16x128xf32>
    %28 = arith.addf %25, %27 : vector<16x128xf32>
    %c0_21 = arith.constant 0 : index
    %c0_22 = arith.constant 0 : index
    %29 = vector.load %arg8[%c0_21, %c0_22] : memref<32x128xbf16, #tpu.memory_space<vmem>>, vector<32x128xbf16>
    %c0_23 = arith.constant 0 : index
    %c0_24 = arith.constant 0 : index
    %30 = vector.load %arg10[%c0_23, %c0_24] : memref<2x32xi32, #tpu.memory_space<vmem>>, vector<2x32xi32>
    %cst_25 = arith.constant 0.000000e+00 : f32
    %31 = vector.broadcast %cst_25 : f32 to vector<2x32xf32>
    %cst_26 = arith.constant 0.000000e+00 : f32
    %32 = vector.broadcast %cst_26 : f32 to vector<2x32xf32>
    %33 = vector.extract_strided_slice %28 {offsets = [0, 0], sizes = [2, 128], strides = [1, 1]} : vector<16x128xf32> to vector<2x128xf32>
    %34 = arith.truncf %31 : vector<2x32xf32> to vector<2x32xbf16>
    %cst_27 = arith.constant dense<0.000000e+00> : vector<2x128xf32>
    %35 = tpu.matmul %34, %29, %cst_27 {dimension_numbers = #tpu.dot_dimension_numbers<[1], [0], [0], [1], [0, 0, 1, 1], [], []>} : vector<2x32xbf16>, vector<32x128xbf16>, vector<2x128xf32> -> vector<2x128xf32>
    %36 = arith.addf %33, %35 : vector<2x128xf32>
    %37 = arith.negf %36 : vector<2x128xf32>
    %38 = math.exp %37 : vector<2x128xf32>
    %cst_28 = arith.constant 1.000000e+00 : f32
    %39 = vector.broadcast %cst_28 : f32 to vector<2x128xf32>
    %40 = arith.addf %39, %38 : vector<2x128xf32>
    %41 = arith.divf %39, %40 : vector<2x128xf32>
    %42 = vector.extract_strided_slice %36 {offsets = [0, 96], sizes = [2, 32], strides = [1, 1]} : vector<2x128xf32> to vector<2x32xf32>
    %43 = math.tanh %42 : vector<2x32xf32>
    %44 = vector.extract_strided_slice %41 {offsets = [0, 32], sizes = [2, 32], strides = [1, 1]} : vector<2x128xf32> to vector<2x32xf32>
    %45 = arith.mulf %44, %32 : vector<2x32xf32>
    %46 = vector.extract_strided_slice %41 {offsets = [0, 0], sizes = [2, 32], strides = [1, 1]} : vector<2x128xf32> to vector<2x32xf32>
    %47 = arith.mulf %46, %43 : vector<2x32xf32>
    %48 = arith.addf %45, %47 : vector<2x32xf32>
    %49 = vector.extract_strided_slice %41 {offsets = [0, 64], sizes = [2, 32], strides = [1, 1]} : vector<2x128xf32> to vector<2x32xf32>
    %50 = math.tanh %48 : vector<2x32xf32>
    %51 = arith.mulf %49, %50 : vector<2x32xf32>
    %c0_i32 = arith.constant 0 : i32
    %52 = vector.broadcast %c0_i32 : i32 to vector<2x32xi32>
    %53 = arith.cmpi sgt, %30, %52 : vector<2x32xi32>
    %54 = arith.select %53, %51, %31 : vector<2x32xi1>, vector<2x32xf32>
    %55 = arith.select %53, %48, %32 : vector<2x32xi1>, vector<2x32xf32>
    %56 = vector.extract_strided_slice %28 {offsets = [2, 0], sizes = [2, 128], strides = [1, 1]} : vector<16x128xf32> to vector<2x128xf32>
    %57 = arith.truncf %54 : vector<2x32xf32> to vector<2x32xbf16>
    %cst_29 = arith.constant dense<0.000000e+00> : vector<2x128xf32>
    %58 = tpu.matmul %57, %29, %cst_29 {dimension_numbers = #tpu.dot_dimension_numbers<[1], [0], [0], [1], [0, 0, 1, 1], [], []>} : vector<2x32xbf16>, vector<32x128xbf16>, vector<2x128xf32> -> vector<2x128xf32>
    %59 = arith.addf %56, %58 : vector<2x128xf32>
    %60 = arith.negf %59 : vector<2x128xf32>
    %61 = math.exp %60 : vector<2x128xf32>
    %cst_30 = arith.constant 1.000000e+00 : f32
    %62 = vector.broadcast %cst_30 : f32 to vector<2x128xf32>
    %63 = arith.addf %62, %61 : vector<2x128xf32>
    %64 = arith.divf %62, %63 : vector<2x128xf32>
    %65 = vector.extract_strided_slice %59 {offsets = [0, 96], sizes = [2, 32], strides = [1, 1]} : vector<2x128xf32> to vector<2x32xf32>
    %66 = math.tanh %65 : vector<2x32xf32>
    %67 = vector.extract_strided_slice %64 {offsets = [0, 32], sizes = [2, 32], strides = [1, 1]} : vector<2x128xf32> to vector<2x32xf32>
    %68 = arith.mulf %67, %55 : vector<2x32xf32>
    %69 = vector.extract_strided_slice %64 {offsets = [0, 0], sizes = [2, 32], strides = [1, 1]} : vector<2x128xf32> to vector<2x32xf32>
    %70 = arith.mulf %69, %66 : vector<2x32xf32>
    %71 = arith.addf %68, %70 : vector<2x32xf32>
    %72 = vector.extract_strided_slice %64 {offsets = [0, 64], sizes = [2, 32], strides = [1, 1]} : vector<2x128xf32> to vector<2x32xf32>
    %73 = math.tanh %71 : vector<2x32xf32>
    %74 = arith.mulf %72, %73 : vector<2x32xf32>
    %c1_i32 = arith.constant 1 : i32
    %75 = vector.broadcast %c1_i32 : i32 to vector<2x32xi32>
    %76 = arith.cmpi sgt, %30, %75 : vector<2x32xi32>
    %77 = arith.select %76, %74, %54 : vector<2x32xi1>, vector<2x32xf32>
    %78 = arith.select %76, %71, %55 : vector<2x32xi1>, vector<2x32xf32>
    %79 = vector.extract_strided_slice %28 {offsets = [4, 0], sizes = [2, 128], strides = [1, 1]} : vector<16x128xf32> to vector<2x128xf32>
    %80 = arith.truncf %77 : vector<2x32xf32> to vector<2x32xbf16>
    %cst_31 = arith.constant dense<0.000000e+00> : vector<2x128xf32>
    %81 = tpu.matmul %80, %29, %cst_31 {dimension_numbers = #tpu.dot_dimension_numbers<[1], [0], [0], [1], [0, 0, 1, 1], [], []>} : vector<2x32xbf16>, vector<32x128xbf16>, vector<2x128xf32> -> vector<2x128xf32>
    %82 = arith.addf %79, %81 : vector<2x128xf32>
    %83 = arith.negf %82 : vector<2x128xf32>
    %84 = math.exp %83 : vector<2x128xf32>
    %cst_32 = arith.constant 1.000000e+00 : f32
    %85 = vector.broadcast %cst_32 : f32 to vector<2x128xf32>
    %86 = arith.addf %85, %84 : vector<2x128xf32>
    %87 = arith.divf %85, %86 : vector<2x128xf32>
    %88 = vector.extract_strided_slice %82 {offsets = [0, 96], sizes = [2, 32], strides = [1, 1]} : vector<2x128xf32> to vector<2x32xf32>
    %89 = math.tanh %88 : vector<2x32xf32>
    %90 = vector.extract_strided_slice %87 {offsets = [0, 32], sizes = [2, 32], strides = [1, 1]} : vector<2x128xf32> to vector<2x32xf32>
    %91 = arith.mulf %90, %78 : vector<2x32xf32>
    %92 = vector.extract_strided_slice %87 {offsets = [0, 0], sizes = [2, 32], strides = [1, 1]} : vector<2x128xf32> to vector<2x32xf32>
    %93 = arith.mulf %92, %89 : vector<2x32xf32>
    %94 = arith.addf %91, %93 : vector<2x32xf32>
    %95 = vector.extract_strided_slice %87 {offsets = [0, 64], sizes = [2, 32], strides = [1, 1]} : vector<2x128xf32> to vector<2x32xf32>
    %96 = math.tanh %94 : vector<2x32xf32>
    %97 = arith.mulf %95, %96 : vector<2x32xf32>
    %c2_i32 = arith.constant 2 : i32
    %98 = vector.broadcast %c2_i32 : i32 to vector<2x32xi32>
    %99 = arith.cmpi sgt, %30, %98 : vector<2x32xi32>
    %100 = arith.select %99, %97, %77 : vector<2x32xi1>, vector<2x32xf32>
    %101 = arith.select %99, %94, %78 : vector<2x32xi1>, vector<2x32xf32>
    %102 = vector.extract_strided_slice %28 {offsets = [6, 0], sizes = [2, 128], strides = [1, 1]} : vector<16x128xf32> to vector<2x128xf32>
    %103 = arith.truncf %100 : vector<2x32xf32> to vector<2x32xbf16>
    %cst_33 = arith.constant dense<0.000000e+00> : vector<2x128xf32>
    %104 = tpu.matmul %103, %29, %cst_33 {dimension_numbers = #tpu.dot_dimension_numbers<[1], [0], [0], [1], [0, 0, 1, 1], [], []>} : vector<2x32xbf16>, vector<32x128xbf16>, vector<2x128xf32> -> vector<2x128xf32>
    %105 = arith.addf %102, %104 : vector<2x128xf32>
    %106 = arith.negf %105 : vector<2x128xf32>
    %107 = math.exp %106 : vector<2x128xf32>
    %cst_34 = arith.constant 1.000000e+00 : f32
    %108 = vector.broadcast %cst_34 : f32 to vector<2x128xf32>
    %109 = arith.addf %108, %107 : vector<2x128xf32>
    %110 = arith.divf %108, %109 : vector<2x128xf32>
    %111 = vector.extract_strided_slice %105 {offsets = [0, 96], sizes = [2, 32], strides = [1, 1]} : vector<2x128xf32> to vector<2x32xf32>
    %112 = math.tanh %111 : vector<2x32xf32>
    %113 = vector.extract_strided_slice %110 {offsets = [0, 32], sizes = [2, 32], strides = [1, 1]} : vector<2x128xf32> to vector<2x32xf32>
    %114 = arith.mulf %113, %101 : vector<2x32xf32>
    %115 = vector.extract_strided_slice %110 {offsets = [0, 0], sizes = [2, 32], strides = [1, 1]} : vector<2x128xf32> to vector<2x32xf32>
    %116 = arith.mulf %115, %112 : vector<2x32xf32>
    %117 = arith.addf %114, %116 : vector<2x32xf32>
    %118 = vector.extract_strided_slice %110 {offsets = [0, 64], sizes = [2, 32], strides = [1, 1]} : vector<2x128xf32> to vector<2x32xf32>
    %119 = math.tanh %117 : vector<2x32xf32>
    %120 = arith.mulf %118, %119 : vector<2x32xf32>
    %c3_i32 = arith.constant 3 : i32
    %121 = vector.broadcast %c3_i32 : i32 to vector<2x32xi32>
    %122 = arith.cmpi sgt, %30, %121 : vector<2x32xi32>
    %123 = arith.select %122, %120, %100 : vector<2x32xi1>, vector<2x32xf32>
    %124 = arith.select %122, %117, %101 : vector<2x32xi1>, vector<2x32xf32>
    %125 = vector.extract_strided_slice %28 {offsets = [8, 0], sizes = [2, 128], strides = [1, 1]} : vector<16x128xf32> to vector<2x128xf32>
    %126 = arith.truncf %123 : vector<2x32xf32> to vector<2x32xbf16>
    %cst_35 = arith.constant dense<0.000000e+00> : vector<2x128xf32>
    %127 = tpu.matmul %126, %29, %cst_35 {dimension_numbers = #tpu.dot_dimension_numbers<[1], [0], [0], [1], [0, 0, 1, 1], [], []>} : vector<2x32xbf16>, vector<32x128xbf16>, vector<2x128xf32> -> vector<2x128xf32>
    %128 = arith.addf %125, %127 : vector<2x128xf32>
    %129 = arith.negf %128 : vector<2x128xf32>
    %130 = math.exp %129 : vector<2x128xf32>
    %cst_36 = arith.constant 1.000000e+00 : f32
    %131 = vector.broadcast %cst_36 : f32 to vector<2x128xf32>
    %132 = arith.addf %131, %130 : vector<2x128xf32>
    %133 = arith.divf %131, %132 : vector<2x128xf32>
    %134 = vector.extract_strided_slice %128 {offsets = [0, 96], sizes = [2, 32], strides = [1, 1]} : vector<2x128xf32> to vector<2x32xf32>
    %135 = math.tanh %134 : vector<2x32xf32>
    %136 = vector.extract_strided_slice %133 {offsets = [0, 32], sizes = [2, 32], strides = [1, 1]} : vector<2x128xf32> to vector<2x32xf32>
    %137 = arith.mulf %136, %124 : vector<2x32xf32>
    %138 = vector.extract_strided_slice %133 {offsets = [0, 0], sizes = [2, 32], strides = [1, 1]} : vector<2x128xf32> to vector<2x32xf32>
    %139 = arith.mulf %138, %135 : vector<2x32xf32>
    %140 = arith.addf %137, %139 : vector<2x32xf32>
    %141 = vector.extract_strided_slice %133 {offsets = [0, 64], sizes = [2, 32], strides = [1, 1]} : vector<2x128xf32> to vector<2x32xf32>
    %142 = math.tanh %140 : vector<2x32xf32>
    %143 = arith.mulf %141, %142 : vector<2x32xf32>
    %c4_i32 = arith.constant 4 : i32
    %144 = vector.broadcast %c4_i32 : i32 to vector<2x32xi32>
    %145 = arith.cmpi sgt, %30, %144 : vector<2x32xi32>
    %146 = arith.select %145, %143, %123 : vector<2x32xi1>, vector<2x32xf32>
    %147 = arith.select %145, %140, %124 : vector<2x32xi1>, vector<2x32xf32>
    %148 = vector.extract_strided_slice %28 {offsets = [10, 0], sizes = [2, 128], strides = [1, 1]} : vector<16x128xf32> to vector<2x128xf32>
    %149 = arith.truncf %146 : vector<2x32xf32> to vector<2x32xbf16>
    %cst_37 = arith.constant dense<0.000000e+00> : vector<2x128xf32>
    %150 = tpu.matmul %149, %29, %cst_37 {dimension_numbers = #tpu.dot_dimension_numbers<[1], [0], [0], [1], [0, 0, 1, 1], [], []>} : vector<2x32xbf16>, vector<32x128xbf16>, vector<2x128xf32> -> vector<2x128xf32>
    %151 = arith.addf %148, %150 : vector<2x128xf32>
    %152 = arith.negf %151 : vector<2x128xf32>
    %153 = math.exp %152 : vector<2x128xf32>
    %cst_38 = arith.constant 1.000000e+00 : f32
    %154 = vector.broadcast %cst_38 : f32 to vector<2x128xf32>
    %155 = arith.addf %154, %153 : vector<2x128xf32>
    %156 = arith.divf %154, %155 : vector<2x128xf32>
    %157 = vector.extract_strided_slice %151 {offsets = [0, 96], sizes = [2, 32], strides = [1, 1]} : vector<2x128xf32> to vector<2x32xf32>
    %158 = math.tanh %157 : vector<2x32xf32>
    %159 = vector.extract_strided_slice %156 {offsets = [0, 32], sizes = [2, 32], strides = [1, 1]} : vector<2x128xf32> to vector<2x32xf32>
    %160 = arith.mulf %159, %147 : vector<2x32xf32>
    %161 = vector.extract_strided_slice %156 {offsets = [0, 0], sizes = [2, 32], strides = [1, 1]} : vector<2x128xf32> to vector<2x32xf32>
    %162 = arith.mulf %161, %158 : vector<2x32xf32>
    %163 = arith.addf %160, %162 : vector<2x32xf32>
    %164 = vector.extract_strided_slice %156 {offsets = [0, 64], sizes = [2, 32], strides = [1, 1]} : vector<2x128xf32> to vector<2x32xf32>
    %165 = math.tanh %163 : vector<2x32xf32>
    %166 = arith.mulf %164, %165 : vector<2x32xf32>
    %c5_i32 = arith.constant 5 : i32
    %167 = vector.broadcast %c5_i32 : i32 to vector<2x32xi32>
    %168 = arith.cmpi sgt, %30, %167 : vector<2x32xi32>
    %169 = arith.select %168, %166, %146 : vector<2x32xi1>, vector<2x32xf32>
    %170 = arith.select %168, %163, %147 : vector<2x32xi1>, vector<2x32xf32>
    %171 = vector.extract_strided_slice %28 {offsets = [12, 0], sizes = [2, 128], strides = [1, 1]} : vector<16x128xf32> to vector<2x128xf32>
    %172 = arith.truncf %169 : vector<2x32xf32> to vector<2x32xbf16>
    %cst_39 = arith.constant dense<0.000000e+00> : vector<2x128xf32>
    %173 = tpu.matmul %172, %29, %cst_39 {dimension_numbers = #tpu.dot_dimension_numbers<[1], [0], [0], [1], [0, 0, 1, 1], [], []>} : vector<2x32xbf16>, vector<32x128xbf16>, vector<2x128xf32> -> vector<2x128xf32>
    %174 = arith.addf %171, %173 : vector<2x128xf32>
    %175 = arith.negf %174 : vector<2x128xf32>
    %176 = math.exp %175 : vector<2x128xf32>
    %cst_40 = arith.constant 1.000000e+00 : f32
    %177 = vector.broadcast %cst_40 : f32 to vector<2x128xf32>
    %178 = arith.addf %177, %176 : vector<2x128xf32>
    %179 = arith.divf %177, %178 : vector<2x128xf32>
    %180 = vector.extract_strided_slice %174 {offsets = [0, 96], sizes = [2, 32], strides = [1, 1]} : vector<2x128xf32> to vector<2x32xf32>
    %181 = math.tanh %180 : vector<2x32xf32>
    %182 = vector.extract_strided_slice %179 {offsets = [0, 32], sizes = [2, 32], strides = [1, 1]} : vector<2x128xf32> to vector<2x32xf32>
    %183 = arith.mulf %182, %170 : vector<2x32xf32>
    %184 = vector.extract_strided_slice %179 {offsets = [0, 0], sizes = [2, 32], strides = [1, 1]} : vector<2x128xf32> to vector<2x32xf32>
    %185 = arith.mulf %184, %181 : vector<2x32xf32>
    %186 = arith.addf %183, %185 : vector<2x32xf32>
    %187 = vector.extract_strided_slice %179 {offsets = [0, 64], sizes = [2, 32], strides = [1, 1]} : vector<2x128xf32> to vector<2x32xf32>
    %188 = math.tanh %186 : vector<2x32xf32>
    %189 = arith.mulf %187, %188 : vector<2x32xf32>
    %c6_i32 = arith.constant 6 : i32
    %190 = vector.broadcast %c6_i32 : i32 to vector<2x32xi32>
    %191 = arith.cmpi sgt, %30, %190 : vector<2x32xi32>
    %192 = arith.select %191, %189, %169 : vector<2x32xi1>, vector<2x32xf32>
    %193 = arith.select %191, %186, %170 : vector<2x32xi1>, vector<2x32xf32>
    %194 = vector.extract_strided_slice %28 {offsets = [14, 0], sizes = [2, 128], strides = [1, 1]} : vector<16x128xf32> to vector<2x128xf32>
    %195 = arith.truncf %192 : vector<2x32xf32> to vector<2x32xbf16>
    %cst_41 = arith.constant dense<0.000000e+00> : vector<2x128xf32>
    %196 = tpu.matmul %195, %29, %cst_41 {dimension_numbers = #tpu.dot_dimension_numbers<[1], [0], [0], [1], [0, 0, 1, 1], [], []>} : vector<2x32xbf16>, vector<32x128xbf16>, vector<2x128xf32> -> vector<2x128xf32>
    %197 = arith.addf %194, %196 : vector<2x128xf32>
    %198 = arith.negf %197 : vector<2x128xf32>
    %199 = math.exp %198 : vector<2x128xf32>
    %cst_42 = arith.constant 1.000000e+00 : f32
    %200 = vector.broadcast %cst_42 : f32 to vector<2x128xf32>
    %201 = arith.addf %200, %199 : vector<2x128xf32>
    %202 = arith.divf %200, %201 : vector<2x128xf32>
    %203 = vector.extract_strided_slice %197 {offsets = [0, 96], sizes = [2, 32], strides = [1, 1]} : vector<2x128xf32> to vector<2x32xf32>
    %204 = math.tanh %203 : vector<2x32xf32>
    %205 = vector.extract_strided_slice %202 {offsets = [0, 32], sizes = [2, 32], strides = [1, 1]} : vector<2x128xf32> to vector<2x32xf32>
    %206 = arith.mulf %205, %193 : vector<2x32xf32>
    %207 = vector.extract_strided_slice %202 {offsets = [0, 0], sizes = [2, 32], strides = [1, 1]} : vector<2x128xf32> to vector<2x32xf32>
    %208 = arith.mulf %207, %204 : vector<2x32xf32>
    %209 = arith.addf %206, %208 : vector<2x32xf32>
    %210 = vector.extract_strided_slice %202 {offsets = [0, 64], sizes = [2, 32], strides = [1, 1]} : vector<2x128xf32> to vector<2x32xf32>
    %211 = math.tanh %209 : vector<2x32xf32>
    %212 = arith.mulf %210, %211 : vector<2x32xf32>
    %c7_i32 = arith.constant 7 : i32
    %213 = vector.broadcast %c7_i32 : i32 to vector<2x32xi32>
    %214 = arith.cmpi sgt, %30, %213 : vector<2x32xi32>
    %215 = arith.select %214, %212, %192 : vector<2x32xi1>, vector<2x32xf32>
    %216 = arith.truncf %22 : vector<2x128xf32> to vector<2x128xbf16>
    %c0_43 = arith.constant 0 : index
    %c0_44 = arith.constant 0 : index
    %217 = vector.load %arg11[%c0_43, %c0_44] : memref<128x32xbf16, #tpu.memory_space<vmem>>, vector<128x32xbf16>
    %cst_45 = arith.constant dense<0.000000e+00> : vector<2x32xf32>
    %218 = tpu.matmul %216, %217, %cst_45 {dimension_numbers = #tpu.dot_dimension_numbers<[1], [0], [0], [1], [0, 0, 1, 1], [], []>} : vector<2x128xbf16>, vector<128x32xbf16>, vector<2x32xf32> -> vector<2x32xf32>
    %219 = arith.truncf %215 : vector<2x32xf32> to vector<2x32xbf16>
    %c0_46 = arith.constant 0 : index
    %c0_47 = arith.constant 0 : index
    %220 = vector.load %arg12[%c0_46, %c0_47] : memref<32x32xbf16, #tpu.memory_space<vmem>>, vector<32x32xbf16>
    %cst_48 = arith.constant dense<0.000000e+00> : vector<2x32xf32>
    %221 = tpu.matmul %219, %220, %cst_48 {dimension_numbers = #tpu.dot_dimension_numbers<[1], [0], [0], [1], [0, 0, 1, 1], [], []>} : vector<2x32xbf16>, vector<32x32xbf16>, vector<2x32xf32> -> vector<2x32xf32>
    %222 = arith.addf %218, %221 : vector<2x32xf32>
    %c0_49 = arith.constant 0 : index
    %c0_50 = arith.constant 0 : index
    %223 = vector.load %arg13[%c0_49, %c0_50] : memref<1x32xf32, #tpu.memory_space<vmem>>, vector<1x32xf32>
    %224 = vector.broadcast %223 : vector<1x32xf32> to vector<2x32xf32>
    %225 = arith.addf %222, %224 : vector<2x32xf32>
    %cst_51 = arith.constant 0.000000e+00 : f32
    %226 = vector.broadcast %cst_51 : f32 to vector<2x32xf32>
    %227 = arith.maximumf %225, %226 : vector<2x32xf32>
    %228 = arith.truncf %227 : vector<2x32xf32> to vector<2x32xbf16>
    %c0_52 = arith.constant 0 : index
    %c0_53 = arith.constant 0 : index
    %229 = vector.load %arg14[%c0_52, %c0_53] : memref<32x128xbf16, #tpu.memory_space<vmem>>, vector<32x128xbf16>
    %cst_54 = arith.constant dense<0.000000e+00> : vector<2x128xf32>
    %230 = tpu.matmul %228, %229, %cst_54 {dimension_numbers = #tpu.dot_dimension_numbers<[1], [0], [0], [1], [0, 0, 1, 1], [], []>} : vector<2x32xbf16>, vector<32x128xbf16>, vector<2x128xf32> -> vector<2x128xf32>
    %c0_55 = arith.constant 0 : index
    %c0_56 = arith.constant 0 : index
    %231 = vector.load %arg15[%c0_55, %c0_56] : memref<1x128xf32, #tpu.memory_space<vmem>>, vector<1x128xf32>
    %232 = vector.broadcast %231 : vector<1x128xf32> to vector<2x128xf32>
    %233 = arith.addf %230, %232 : vector<2x128xf32>
    %c0_57 = arith.constant 0 : index
    %c0_58 = arith.constant 0 : index
    %234 = vector.load %arg16[%c0_57, %c0_58] : memref<2x128xf32, #tpu.memory_space<vmem>>, vector<2x128xf32>
    tpu.vector_store %arg16[%c0_57, %c0_58], %233 {strides = array<i32>} : memref<2x128xf32, #tpu.memory_space<vmem>>, vector<2x128xf32>,
    return
  }
  func.func @transform_0(%arg0: i32) -> (i32, i32) {
    %c0_i32 = arith.constant 0 : i32
    %c0_i32_0 = arith.constant 0 : i32
    %c0_i32_1 = arith.constant 0 : i32
    return %c0_i32, %c0_i32_0 : i32, i32
  }
  func.func @transform_1(%arg0: i32) -> (i32, i32) {
    %c0_i32 = arith.constant 0 : i32
    %c0_i32_0 = arith.constant 0 : i32
    %c0_i32_1 = arith.constant 0 : i32
    return %c0_i32, %c0_i32_0 : i32, i32
  }
  func.func @transform_2(%arg0: i32) -> (i32, i32) {
    %c0_i32 = arith.constant 0 : i32
    %c0_i32_0 = arith.constant 0 : i32
    %c0_i32_1 = arith.constant 0 : i32
    return %c0_i32, %c0_i32_0 : i32, i32
  }
  func.func @transform_3(%arg0: i32) -> (i32, i32) {
    %c0_i32 = arith.constant 0 : i32
    %c0_i32_0 = arith.constant 0 : i32
    %c0_i32_1 = arith.constant 0 : i32
    return %c0_i32, %c0_i32_0 : i32, i32
  }
  func.func @transform_4(%arg0: i32) -> (i32, i32) {
    %c0_i32 = arith.constant 0 : i32
    %c0_i32_0 = arith.constant 0 : i32
    %c0_i32_1 = arith.constant 0 : i32
    return %c0_i32, %c0_i32_0 : i32, i32
  }
  func.func @transform_5(%arg0: i32) -> (i32, i32) {
    %c0_i32 = arith.constant 0 : i32
    %c0_i32_0 = arith.constant 0 : i32
    %c0_i32_1 = arith.constant 0 : i32
    return %c0_i32, %c0_i32_0 : i32, i32
  }
  func.func @transform_6(%arg0: i32) -> (i32, i32) {
    %c0_i32 = arith.constant 0 : i32
    %c0_i32_0 = arith.constant 0 : i32
    %c0_i32_1 = arith.constant 0 : i32
    return %c0_i32, %c0_i32_0 : i32, i32
  }
  func.func @transform_7(%arg0: i32) -> (i32, i32) {
    %c0_i32 = arith.constant 0 : i32
    %c0_i32_0 = arith.constant 0 : i32
    %c0_i32_1 = arith.constant 0 : i32
    return %c0_i32, %c0_i32_0 : i32, i32
  }
  func.func @transform_8(%arg0: i32) -> (i32, i32) {
    %c0_i32 = arith.constant 0 : i32
    %c0_i32_0 = arith.constant 0 : i32
    %c0_i32_1 = arith.constant 0 : i32
    return %c0_i32, %c0_i32_0 : i32, i32
  }
  func.func @transform_9(%arg0: i32) -> (i32, i32) {
    %c0_i32 = arith.constant 0 : i32
    %c0_i32_0 = arith.constant 0 : i32
    %c0_i32_1 = arith.constant 0 : i32
    return %c0_i32, %c0_i32_0 : i32, i32
  }
  func.func @transform_10(%arg0: i32) -> (i32, i32) {
    %c0_i32 = arith.constant 0 : i32
    %c0_i32_0 = arith.constant 0 : i32
    %c0_i32_1 = arith.constant 0 : i32
    return %c0_i32, %c0_i32_0 : i32, i32
  }
  func.func @transform_11(%arg0: i32) -> (i32, i32) {
    %c0_i32 = arith.constant 0 : i32
    %c0_i32_0 = arith.constant 0 : i32
    %c0_i32_1 = arith.constant 0 : i32
    return %c0_i32, %c0_i32_0 : i32, i32
  }
  func.func @transform_12(%arg0: i32) -> (i32, i32) {
    %c0_i32 = arith.constant 0 : i32
    %c0_i32_0 = arith.constant 0 : i32
    %c0_i32_1 = arith.constant 0 : i32
    return %c0_i32, %c0_i32_0 : i32, i32
  }
  func.func @transform_13(%arg0: i32) -> (i32, i32) {
    %c0_i32 = arith.constant 0 : i32
    %c0_i32_0 = arith.constant 0 : i32
    %c0_i32_1 = arith.constant 0 : i32
    return %c0_i32, %c0_i32_0 : i32, i32
  }
  func.func @transform_14(%arg0: i32) -> (i32, i32) {
    %c0_i32 = arith.constant 0 : i32
    %c0_i32_0 = arith.constant 0 : i32
    %c0_i32_1 = arith.constant 0 : i32
    return %c0_i32, %c0_i32_0 : i32, i32
  }
  func.func @transform_15(%arg0: i32) -> (i32, i32) {
    %c0_i32 = arith.constant 0 : i32
    %c0_i32_0 = arith.constant 0 : i32
    %c0_i32_1 = arith.constant 0 : i32
    return %c0_i32, %c0_i32_0 : i32, i32
  }
}

</mosaic_0001>

<bundles_post_ra>
// kernel: tpu_custom_call.1
= control target key start
LH: loop header
LB: loop body
LE: loop exit
PB: predicated region body
PF: predicated region fallthrough
CT: control target
= control target key end

     0   :  { %20 = vsyncpa [#allocation3], 0  ;;  %s2240_s0 = inlined_call_operand.vmem [shape: bf16[36,512], index: 0, kind: input, shape index: {}]   ;;  %s2241_s1 = inlined_call_operand.hbm [shape: bf16[8,36], index: 1, kind: input, shape index: {}]   ;;  %s2242_s2 = inlined_call_operand.vmem [shape: f32[8,1], index: 2, kind: input, shape index: {}]   ;;  %s2243_s3 = inlined_call_operand.hbm [shape: bf16[256,128], index: 3, kind: input, shape index: {}]   ;;  %s2244_s4 = inlined_call_operand.hbm [shape: f32[8,128], index: 4, kind: input, shape index: {}]   ;;  %s2245_s5 = inlined_call_operand.hbm [shape: bf16[16,16], index: 5, kind: input, shape index: {}]   ;;  %s2246_s6 = inlined_call_operand.hbm [shape: bf16[16,128], index: 6, kind: input, shape index: {}]   ;;  %s2247_s7 = inlined_call_operand.hbm [shape: bf16[32,128], index: 7, kind: input, shape index: {}]   ;;  %s2248_s8 = inlined_call_operand.hbm [shape: f32[1,128], index: 8, kind: input, shape index: {}]   ;;  %s2249_s9 = inlined_call_operand.vmem [shape: s32[2,32], index: 9, kind: input, shape index: {}]   ;;  %s2250_s10 = inlined_call_operand.vmem [shape: bf16[128,32], index: 10, kind: input, shape index: {}]   ;;  %s2251_s11 = inlined_call_operand.hbm [shape: bf16[32,32], index: 11, kind: input, shape index: {}]   ;;  %s2252_s12 = inlined_call_operand.vmem [shape: f32[1,32], index: 12, kind: input, shape index: {}]   ;;  %s2253_s13 = inlined_call_operand.hbm [shape: bf16[32,128], index: 13, kind: input, shape index: {}]   ;;  %s2254_s14 = inlined_call_operand.vmem [shape: f32[1,128], index: 14, kind: input, shape index: {}]   ;;  %s2255_s15 = inlined_call_operand.hbm [shape: f32[2,128], index: 15, kind: output, shape index: {}]  }
   0x1   :  { %21 = vsyncpa [#allocation6], 0 }
   0x2   :  { %22 = vsyncpa [#allocation9], 0 }
   0x3   :  { %23 = vsyncpa [#allocation12], 0 }
   0x4   :  { %24 = vsyncpa [#allocation15], 0  ;;  %s45_s20 = sshll.u32 %s2243_s3, 4  ;;  %s46_s20 = int_to_ptr.hbm [resolvable:$true] %s45_s20 }
   0x5   :  { %25 = vsyncpa [#allocation4], 0  ;;  %s1900_s21 = smov [#allocation5]   ;;  %s69_s25 = sshll.u32 %s2245_s5, 4  ;;  %s70_s25 = int_to_ptr.hbm [resolvable:$true] %s69_s25 }
   0x6   :  { %s47_s22 = sshll.u32 %s1900_s21, 4  ;;  %s1901_s26 = smov 64   ;;  %s48_s22 = int_to_ptr.vmem [resolvable:$true] %s47_s22 }
   0x7   :  { %s1902_s27 = smov 4   ;;  %s1903_s28 = smov [#allocation8]  }
   0x8   :  { %53 = dma.hbm_to_vmem [thread:$0]  %s46_s20, 2048, %s48_s22, [#allocation6], %s1901_s26, %s1901_s26, %s1902_s27  }
   0x9   :  { %s71_s29 = sshll.u32 %s1903_s28, 4  ;;  %s95_s16 = sshll.u32 %s2247_s7, 4  ;;  %s72_s29 = int_to_ptr.vmem [resolvable:$true] %s71_s29  ;;  %s96_s16 = int_to_ptr.hbm [resolvable:$true] %s95_s16 }
   0xa   :  { %77 = dma.hbm_to_vmem [thread:$0]  %s70_s25, 128, %s72_s29, [#allocation9], %s1901_s26, %s1901_s26, %s1902_s27  }
   0xb   :  { %s123_s18 = sshll.u32 %s2251_s11, 4  ;;  %s1904_s19 = smov [#allocation11]   ;;  %s124_s18 = int_to_ptr.hbm [resolvable:$true] %s123_s18 }
   0xc   :  { %s97_s21 = sshll.u32 %s1904_s19, 4  ;;  %s1905_s20 = smov [#allocation14]   ;;  %s98_s21 = int_to_ptr.vmem [resolvable:$true] %s97_s21 }
   0xd   :  { %103 = dma.hbm_to_vmem [thread:$0]  %s96_s16, 256, %s98_s21, [#allocation12], %s1901_s26, %s1901_s26, %s1902_s27  }
   0xe   :  { %s125_s7 = sshll.u32 %s1905_s20, 4  ;;  %s33_s24 = sshll.u32 %s2241_s1, 4  ;;  %s126_s7 = int_to_ptr.vmem [resolvable:$true] %s125_s7  ;;  %s34_s24 = int_to_ptr.hbm [resolvable:$true] %s33_s24 }
   0xf   :  { %131 = dma.hbm_to_vmem [thread:$0]  %s124_s18, 256, %s126_s7, [#allocation15], %s1901_s26, %s1901_s26, %s1902_s27  }
  0x10   :  { %s59_s28 = sshll.u32 %s2244_s4, 4  ;;  %s1906_s29 = smov [#allocation2]   ;;  %s60_s28 = int_to_ptr.hbm [resolvable:$true] %s59_s28 }
  0x11   :  { %s35_s30 = sshll.u32 %s1906_s29, 4  ;;  %s1907_s3 = smov [#allocation7]   ;;  %s36_s30 = int_to_ptr.vmem [resolvable:$true] %s35_s30 }
  0x12   :  { %38 = dma.hbm_to_vmem [thread:$0]  %s34_s24, 64, %s36_s30, [#allocation3]  }
  0x13   :  { %s61_s16 = sshll.u32 %s1907_s3, 4  ;;  %s82_s1 = sshll.u32 %s2246_s6, 4  ;;  %s62_s16 = int_to_ptr.vmem [resolvable:$true] %s61_s16  ;;  %s83_s1 = int_to_ptr.hbm [resolvable:$true] %s82_s1 }
  0x14   :  { %64 = dma.hbm_to_vmem [thread:$0]  %s60_s28, 128, %s62_s16, [#allocation6]  }
  0x15   :  { %s109_s21 = sshll.u32 %s2248_s8, 4  ;;  %s1908_s20 = smov [#allocation10]   ;;  %s110_s21 = int_to_ptr.hbm [resolvable:$true] %s109_s21 }
  0x16   :  { %s84_s4 = sshll.u32 %s1908_s20, 4  ;;  %s1909_s7 = smov [#allocation13]   ;;  %s85_s4 = int_to_ptr.vmem [resolvable:$true] %s84_s4 }
  0x17   :  { %90 = dma.hbm_to_vmem [thread:$0]  %s83_s1, 128, %s85_s4, [#allocation9], %s1901_s26, %s1901_s26, %s1902_s27  }
  0x18   :  { %s111_s22 = sshll.u32 %s1909_s7, 4  ;;  %s138_s6 = sshll.u32 %s2253_s13, 4  ;;  %s112_s22 = int_to_ptr.vmem [resolvable:$true] %s111_s22  ;;  %s139_s6 = int_to_ptr.hbm [resolvable:$true] %s138_s6 }
  0x19   :  { %114 = dma.hbm_to_vmem [thread:$0]  %s110_s21, 16, %s112_s22, [#allocation12]  }
  0x1a   :  { %s1910_s11 = smov [#allocation16]  }
  0x1b   :  { %s140_s25 = sshll.u32 %s1910_s11, 4  ;;  %s141_s25 = int_to_ptr.vmem [resolvable:$true] %s140_s25 }
  0x1c   :  { %146 = dma.hbm_to_vmem [thread:$0]  %s139_s6, 256, %s141_s25, [#allocation15], %s1901_s26, %s1901_s26, %s1902_s27  }
  0x1d   :  { %1888 = dma.done.wait [#allocation3], 64  }
  0x1e   :  { %1889 = vsyncadd [#allocation3], 4294967232 }
  0x1f   :  { %1890 = dma.done.wait [#allocation6], 2176  }
  0x20   :  { %1891 = vsyncadd [#allocation6], 4294965120 }
  0x21   :  { %1892 = dma.done.wait [#allocation9], 256  }
  0x22   :  { %1893 = vsyncadd [#allocation9], 4294967040 }
  0x23   :  { %1894 = dma.done.wait [#allocation12], 272  }
  0x24   :  { %1895 = vsyncadd [#allocation12], 4294967024 }
  0x25   :  { %1896 = dma.done.wait [#allocation15], 512  }
  0x26   :  { %1897 = vsyncadd [#allocation15], 4294966784  ;;  %v1911_v0 = vmov 0   ;;  %v195_v1 = vld [vmem:[%s2240_s0 + $0x40] sm:$0x33]  ;;  %vm257_vm0 = vcmask 1041408  }
  0x27   :  { %1580 = vset.pattern.permute.xlu0 %v1911_v0  ;;  %v196_v2 = vld [vmem:[%s2240_s0 + $0x48] sm:$0x33]  ;;  %v229_v3 = vunpack.c.l.b16 %v195_v1  ;;  %v230_v4 = vunpack.c.h.b16 %v195_v1  ;;  %v1361_v7 = vld [vmem:[%s2240_s0 + $0x20] sm:$0xf]  ;;  %v1531_v8 = vld [vmem:[%s2240_s0 + $0x2c] sm:$0xf0] }
  0x28   :  { %v231_v5 = vunpack.c.l.b16 %v196_v2  ;;  %v232_v6 = vunpack.c.h.b16 %v196_v2  ;;  %v1529_v13 = vld [vmem:[%s2240_s0 + $0x24] sm:$0xf]  ;;  %v1363_v14 = vld [vmem:[%s2240_s0 + $0x30] sm:$0xf0]  ;;  %v1369_v15 = vld [vmem:[%s2240_s0 + $0x28] sm:$0xf]  ;;  %v1362_v23 = vor.u32 %v1531_v8, %v1361_v7 }
  0x29   :  { %v241_v9 = vpack.c.b16 %v229_v3, %v229_v3  ;;  %v242_v10 = vpack.c.b16 %v230_v4, %v230_v4  ;;  %v1532_v16 = vld [vmem:[%s2240_s0 + $0x34] sm:$0xf0]  ;;  %v1530_v17 = vld [vmem:[%s2240_s0 + $0x2c] sm:$0xf]  ;;  %v1371_v18 = vld [vmem:[%s2240_s0 + $0x38] sm:$0xf0]  ;;  %v1366_v24 = vor.u32 %v1529_v13, %v1363_v14 }
  0x2a   :  { %v243_v11 = vpack.c.b16 %v231_v5, %v231_v5  ;;  %v244_v12 = vpack.c.b16 %v232_v6, %v232_v6  ;;  %v1345_v25 = vld [vmem:[%s2240_s0] sm:$0xf]  ;;  %v1527_v26 = vld [vmem:[%s2240_s0 + $0xc] sm:$0xf0]  ;;  %v1525_v27 = vld [vmem:[%s2240_s0 + $0x4] sm:$0xf]  ;;  %v1370_v28 = vor.u32 %v1532_v16, %v1369_v15  ;;  %v1374_v29 = vor.u32 %v1530_v17, %v1371_v18 }
  0x2b   :  { %v259_v19 = vsel %vm257_vm0, %v241_v9, 0  ;;  %v262_v20 = vsel %vm257_vm0, %v242_v10, 0  ;;  %v1347_v30 = vld [vmem:[%s2240_s0 + $0x10] sm:$0xf0]  ;;  %v1353_v31 = vld [vmem:[%s2240_s0 + $0x8] sm:$0xf]  ;;  %v1346_v36 = vor.u32 %v1527_v26, %v1345_v25 }
  0x2c   :  { %v265_v21 = vsel %vm257_vm0, %v243_v11, 0  ;;  %v268_v22 = vsel %vm257_vm0, %v244_v12, 0  ;;  %275 = vmatpush.bf16.msra.mxu0 %v259_v19  ;;  %288 = vmatpush.bf16.msra.mxu1 %v262_v20  ;;  %v197_v32 = vld [vmem:[%s2242_s2] sm:$0xff]  ;;  %v1528_v33 = vld [vmem:[%s2240_s0 + $0x14] sm:$0xf0]  ;;  %v1350_v37 = vor.u32 %v1525_v27, %v1347_v30  ;;  %vm253_vm1 = vcmask 293888  }
  0x2d   :  { %301 = vmatpush.bf16.msra.mxu2 %v265_v21  ;;  %314 = vmatpush.bf16.msra.mxu3 %v268_v22  ;;  %v1526_v34 = vld [vmem:[%s2240_s0 + $0xc] sm:$0xf]  ;;  %v1355_v35 = vld [vmem:[%s2240_s0 + $0x18] sm:$0xf0]  ;;  %v1354_v38 = vor.u32 %v1528_v33, %v1353_v31  ;;  %v186_v42 = vld [vmem:[#allocation2] sm:$0xf] }
  0x2e   :  { %200 = vperm.xlu0 %1580, %v197_v32   ;;  %v1358_v39 = vor.u32 %v1526_v34, %v1355_v35  ;;  %v1540_v40 = vld [vmem:[#allocation5 + $0x38] sm:$0xff]  ;;  %v1539_v43 = vld [vmem:[#allocation5 + $0x30] sm:$0xff]  ;;  %v1538_v45 = vld [vmem:[#allocation5 + $0x28] sm:$0xff]  ;;  %vm546_vm2 = vcmask 130048   ;;  %vm525_vm3 = vcmask 1040384   ;;  %s1912_s0 = smov 32  }
  0x2f   :  { %v1548_v41 = vld [vmem:[#allocation5 + $0x78] sm:$0xff]  ;;  %v1547_v44 = vld [vmem:[#allocation5 + $0x70] sm:$0xff]  ;;  %v1546_v46 = vld [vmem:[#allocation5 + $0x68] sm:$0xff]  ;;  %s1913_s2 = smov 96   ;;  %vm581_vm9 = vcmask 261120   ;;  %s1914_s19 = smov [#allocation17]  }
  0x30   :  { %276 = vmatpush.bf16.msra.mxu0 %v1362_v23  ;;  %289 = vmatpush.bf16.msra.mxu1 %v1366_v24  ;;  %v1537_v47 = vld [vmem:[#allocation5 + $0x20] sm:$0xff]  ;;  %v1536_v49 = vld [vmem:[#allocation5 + $0x18] sm:$0xff]  ;;  %v1535_v51 = vld [vmem:[#allocation5 + $0x10] sm:$0xff]  ;;  %s1327_s18 = sshll.u32 %s1914_s19, 4  ;;  %s1328_s18 = int_to_ptr.vmem [resolvable:$true] %s1327_s18 }
  0x31   :  { %302 = vmatpush.bf16.msra.mxu2 %v1370_v28  ;;  %315 = vmatpush.bf16.msra.mxu3 %v1374_v29  ;;  %v1545_v48 = vld [vmem:[#allocation5 + $0x60] sm:$0xff]  ;;  %v1544_v50 = vld [vmem:[#allocation5 + $0x58] sm:$0xff]  ;;  %v1543_v52 = vld [vmem:[#allocation5 + $0x50] sm:$0xff] }
  0x32   :  { %v1534_v53 = vld [vmem:[#allocation5 + $0x8] sm:$0xff]  ;;  %v1533_v55 = vld [vmem:[#allocation5] sm:$0xff]  ;;  %v1550_v57 = vld [vmem:[#allocation10] sm:$0xff] }
  0x33   :  { %v1542_v54 = vld [vmem:[#allocation5 + $0x48] sm:$0xff]  ;;  %v1541_v56 = vld [vmem:[#allocation5 + $0x40] sm:$0xff]  ;;  %v1551_v59 = vld [vmem:[#allocation11] sm:$0xff] }
  0x34   :  { %277 = vmatpush.bf16.msra.mxu0 %v1346_v36  ;;  %290 = vmatpush.bf16.msra.mxu1 %v1350_v37  ;;  %v1552_v58 = vld [vmem:[#allocation11 + $0x8] sm:$0xff]  ;;  %v1549_v18 = vld [vmem:[#allocation8] sm:$0xff] }
  0x35   :  { %303 = vmatpush.bf16.msra.mxu2 %v1354_v38  ;;  %316 = vmatpush.bf16.msra.mxu3 %v1358_v39  ;;  %v358_v21 = vld [vmem:[#allocation7] sm:$0xff]  ;;  %v2103_v30 = vld [vmem:[#allocation13] ss:$0 sm:$0xff] }
  0x37   :  { %1375 = vmatmul.msk.bf16.vlgmr.msra.gmra.mxu0 %vm253_vm1, %v186_v42  ;;  %1376 = vmatmul.msk.bf16.vlgmr.msra.gmra.mxu1 %vm253_vm1, %v186_v42 }
  0x38   :  { %457 = vmatpush.bf16.msrb.mxu0 %v1540_v40  ;;  %470 = vmatpush.bf16.msrb.mxu1 %v1548_v41 }
  0x39   :  { %1377 = vmatmul.msk.bf16.vlgmr.msra.gmra.mxu2 %vm253_vm1, %v186_v42  ;;  %1378 = vmatmul.msk.bf16.vlgmr.msra.gmra.mxu3 %vm253_vm1, %v186_v42 }
  0x3a   :  { %492 = vmatpush.bf16.msrb.mxu2 %v1540_v40  ;;  %505 = vmatpush.bf16.msrb.mxu3 %v1548_v41 }
  0x3c   :  { %458 = vmatpush.bf16.msrb.mxu0 %v1539_v43  ;;  %471 = vmatpush.bf16.msrb.mxu1 %v1547_v44 }
  0x3e   :  { %493 = vmatpush.bf16.msrb.mxu2 %v1539_v43  ;;  %506 = vmatpush.bf16.msrb.mxu3 %v1547_v44 }
  0x40   :  { %459 = vmatpush.bf16.msrb.mxu0 %v1538_v45  ;;  %472 = vmatpush.bf16.msrb.mxu1 %v1546_v46 }
  0x42   :  { %494 = vmatpush.bf16.msrb.mxu2 %v1538_v45  ;;  %507 = vmatpush.bf16.msrb.mxu3 %v1546_v46 }
  0x44   :  { %460 = vmatpush.bf16.msrb.mxu0 %v1537_v47  ;;  %473 = vmatpush.bf16.msrb.mxu1 %v1545_v48 }
  0x46   :  { %495 = vmatpush.bf16.msrb.mxu2 %v1537_v47  ;;  %508 = vmatpush.bf16.msrb.mxu3 %v1545_v48 }
  0x48   :  { %461 = vmatpush.bf16.msrb.mxu0 %v1536_v49  ;;  %474 = vmatpush.bf16.msrb.mxu1 %v1544_v50 }
  0x4a   :  { %496 = vmatpush.bf16.msrb.mxu2 %v1536_v49  ;;  %509 = vmatpush.bf16.msrb.mxu3 %v1544_v50 }
  0x4c   :  { %462 = vmatpush.bf16.msrb.mxu0 %v1535_v51  ;;  %475 = vmatpush.bf16.msrb.mxu1 %v1543_v52 }
  0x4e   :  { %497 = vmatpush.bf16.msrb.mxu2 %v1535_v51  ;;  %510 = vmatpush.bf16.msrb.mxu3 %v1543_v52 }
  0x50   :  { %463 = vmatpush.bf16.msrb.mxu0 %v1534_v53  ;;  %476 = vmatpush.bf16.msrb.mxu1 %v1542_v54 }
  0x52   :  { %498 = vmatpush.bf16.msrb.mxu2 %v1534_v53  ;;  %511 = vmatpush.bf16.msrb.mxu3 %v1542_v54 }
  0x54   :  { %464 = vmatpush.bf16.msrb.mxu0 %v1533_v55  ;;  %477 = vmatpush.bf16.msrb.mxu1 %v1541_v56 }
  0x56   :  { %499 = vmatpush.bf16.msrb.mxu2 %v1533_v55  ;;  %512 = vmatpush.bf16.msrb.mxu3 %v1541_v56 }
  0x58   :  { %557 = vmatpush.bf16.msra.mxu0 %v1550_v57  ;;  %591 = vmatpush.bf16.msra.mxu1 %v1552_v58 }
  0x5a   :  { %657 = vmatpush.bf16.msra.mxu2 %v1552_v58  ;;  %733 = vmatpush.bf16.msra.mxu3 %v1552_v58 }
  0x5c   :  { %592 = vmatpush.bf16.msra.mxu1 %v1551_v59 }
  0x5e   :  { %658 = vmatpush.bf16.msra.mxu2 %v1551_v59  ;;  %734 = vmatpush.bf16.msra.mxu3 %v1551_v59 }
  0xa0   :  { %v201_v60 = vpop.permute.xlu0 %200 }
  0xb4   :  { %v279_v61 = vpop.f32.mrf.mxu0  ;;  %v292_v62 = vpop.f32.mrf.mxu1 }
  0xb5   :  { %v280_v63 = vadd.f32 %v279_v61, %v201_v60  ;;  %v293_v1 = vadd.f32 %v292_v62, %v201_v60 }
  0xb7   :  { %v322_v2 = vmax.f32 %v280_v63, 0.0  ;;  %v323_v3 = vmax.f32 %v293_v1, 0.0 }
  0xb9   :  { %v359_v4 = vpack.c.bf16 %v322_v2, %v322_v2  ;;  %v360_v5 = vpack.c.bf16 %v323_v3, %v323_v3 }
  0xbb   :  { %465 = vmatmul.bf16.vlgmr.msrb.gmra.mxu0 %v359_v4  ;;  %478 = vmatmul.bf16.vlgmr.msrb.gmra.mxu1 %v360_v5 }
  0xbc   :  { %v305_v6 = vpop.f32.mrf.mxu2  ;;  %v318_v7 = vpop.f32.mrf.mxu3  ;;  %809 = vmatpush.bf16.msrb.mxu0 %v1552_v58  ;;  %885 = vmatpush.bf16.msrb.mxu1 %v1552_v58 }
  0xbd   :  { %v306_v8 = vadd.f32 %v305_v6, %v201_v60  ;;  %v319_v9 = vadd.f32 %v318_v7, %v201_v60  ;;  %v281_v10 = vpop.f32.mrf.mxu0  ;;  %v294_v11 = vpop.f32.mrf.mxu1 }
  0xbf   :  { %v324_v12 = vmax.f32 %v306_v8, 0.0  ;;  %v325_v13 = vmax.f32 %v319_v9, 0.0  ;;  %v2119_v9 = vld [vmem:[%s2249_s9] sm:$0x3] }
  0xc0   :  { %810 = vmatpush.bf16.msrb.mxu0 %v1551_v59  ;;  %886 = vmatpush.bf16.msrb.mxu1 %v1551_v59  ;;  %vm636_vm8 = vcmp.gt.s32.totalorder %v2119_v9, 0  ;;  %vm710_vm14 = vcmp.gt.s32.totalorder %v2119_v9, 1 }
  0xc1   :  { %v490_v14 = vpack.c.bf16 %v324_v12, %v324_v12  ;;  %v491_v15 = vpack.c.bf16 %v325_v13, %v325_v13 }
  0xc3   :  { %500 = vmatmul.bf16.vlgmr.msrb.gmra.mxu2 %v490_v14  ;;  %513 = vmatmul.bf16.vlgmr.msrb.gmra.mxu3 %v491_v15 }
  0xc4   :  { %v307_v16 = vpop.f32.mrf.mxu2  ;;  %v320_v17 = vpop.f32.mrf.mxu3  ;;  %955 = vmatpush.bf16.msrb.mxu2 %v1552_v58  ;;  %1031 = vmatpush.bf16.msrb.mxu3 %v1552_v58 }
  0xc8   :  { %956 = vmatpush.bf16.msrb.mxu2 %v1551_v59  ;;  %1032 = vmatpush.bf16.msrb.mxu3 %v1551_v59 }
  0xcb   :  { %1451 = vmatmul.msk.bf16.vlgmr.msra.gmra.mxu0 %vm546_vm2, %v1549_v18  ;;  %593 = vmatmul.bf16.vlgmr.msra.gmra.mxu1 %v1911_v0 }
  0xcc   :  { %1107 = vmatpush.bf16.msra.mxu0 %v1552_v58 }
  0xd0   :  { %1108 = vmatpush.bf16.msra.mxu0 %v1551_v59 }
 0x138   :  { %v466_v19 = vpop.f32.mrf.mxu0  ;;  %v479_v20 = vpop.f32.mrf.mxu1 }
 0x139   :  { %v480_v22 = vadd.f32 %v479_v20, %v466_v19 }
 0x13b   :  { %v483_v23 = vmul.f32 %v480_v22, %v358_v21 }
 0x13d   :  { %v484_v24 = vrot.slane %v483_v23, 4 }
 0x13f   :  { %v485_v27 = vadd.f32 %v484_v24, %v483_v23 }
 0x140   :  { %v468_v25 = vpop.f32.mrf.mxu0  ;;  %v481_v26 = vpop.f32.mrf.mxu1 }
 0x141   :  { %v486_v32 = vrot.slane %v485_v27, 2 }
 0x143   :  { %v487_v38 = vadd.f32 %v486_v32, %v485_v27 }
 0x145   :  { %v488_v43 = vrot.slane %v487_v38, 1 }
 0x146   :  { %v501_v28 = vpop.f32.mrf.mxu2  ;;  %v514_v29 = vpop.f32.mrf.mxu3 }
 0x147   :  { %v515_v31 = vadd.f32 %v514_v29, %v501_v28  ;;  %v489_v48 = vadd.f32 %v488_v43, %v487_v38 }
 0x148   :  { %v559_v34 = vpop.f32.mrf.mxu0  ;;  %v594_v0 = vpop.f32.mrf.mxu1 }
 0x149   :  { %v518_v33 = vmul.f32 %v515_v31, %v358_v21  ;;  %v2106_v35 = vadd.f32 %v2103_v30, %v559_v34 }
 0x14b   :  { %v519_v36 = vrot.slane %v518_v33, 4  ;;  %v598_v37 = vadd.f32 %v594_v0, %v2106_v35 }
 0x14d   :  { %v520_v39 = vadd.f32 %v519_v36, %v518_v33  ;;  %1584 = vtanh.f32 %v598_v37  ;;  %v1460_v51 = vmul.f32 -1.442695, %v598_v37 }
 0x14e   :  { %v503_v40 = vpop.f32.mrf.mxu2  ;;  %v516_v41 = vpop.f32.mrf.mxu3 }
 0x14f   :  { %v521_v42 = vrot.slane %v520_v39, 2  ;;  %1586 = vpow2.f32 %v1460_v51 }
 0x150   :  { %v596_v45 = vpop.f32.mrf.mxu1 }
 0x151   :  { %v522_v44 = vadd.f32 %v521_v42, %v520_v39 }
 0x153   :  { %v523_v46 = vrot.slane %v522_v44, 1  ;;  %v1585_v47 = vpop.eup %1584 }
 0x154   :  { %621 = vrot.lane.b32.xlu0 %v1585_v47, %s1912_s0 }
 0x155   :  { %v524_v49 = vadd.f32 %v523_v46, %v522_v44  ;;  %v1587_v52 = vpop.eup %1586 }
 0x156   :  { %v602_v53 = vadd.f32 1.0, %v1587_v52 }
 0x157   :  { %v2110_v50 = vsel %vm525_vm3, %v489_v48, %v524_v49  ;;  %vm786_vm3 = vcmp.gt.s32.totalorder %v2119_v9, 2 }
 0x158   :  { %1588 = vrcp.f32 %v602_v53  ;;  %v614_v59 = vand.u32 2147483648, %v602_v53  ;;  %vm608_vm5 = vweird.f32 %v602_v53  ;;  %v612_v60 = vand.u32 2147483647, %v602_v53 }
 0x15a   :  { %v615_v62 = vor.u32 1.1754944e-38, %v614_v59  ;;  %vm613_vm7 = vcmp.eq.f32.partialorder %v612_v60, 8.507059e+37 }
 0x15e   :  { %v1589_v54 = vpop.eup %1588 }
 0x15f   :  { %v604_v55 = vmul.f32 %v1589_v54, %v602_v53  ;;  %vm609_vm4 = vweird.f32 %v1589_v54 }
 0x160   :  { %vm610_vm6 = vmor %vm608_vm5, %vm609_vm4 }
 0x161   :  { %v605_v56 = vsub.f32 1.0, %v604_v55 }
 0x163   :  { %v606_v57 = vmul.f32 %v1589_v54, %v605_v56 }
 0x165   :  { %v607_v58 = vadd.f32 %v1589_v54, %v606_v57 }
 0x167   :  { %v611_v61 = vsel %vm610_vm6, %v1589_v54, %v607_v58 }
 0x168   :  { %v616_v1 = vsel %vm613_vm7, %v615_v62, %v611_v61 }
 0x169   :  { %v619_v3 = vmul.f32 0.0, %v616_v1 }
 0x1c6   :  { %v622_v63 = vpop.permute.xlu0 %621 }
 0x1c7   :  { %v624_v2 = vmul.f32 %v622_v63, %v616_v1 }
 0x1c9   :  { %626 = vrot.lane.b32.xlu1 %v624_v2, %s1912_s0 }
 0x23b   :  { %v627_v4 = vpop.permute.xlu1 %626 }
 0x23c   :  { %v629_v5 = vadd.f32 %v627_v4, %v619_v3 }
 0x23e   :  { %1590 = vtanh.f32 %v629_v5 }
 0x244   :  { %v1591_v6 = vpop.eup %1590 }
 0x245   :  { %632 = vrot.lane.b32.xlu1 %v1591_v6, %s1912_s0 }
 0x2b7   :  { %v633_v7 = vpop.permute.xlu1 %632 }
 0x2b8   :  { %v635_v8 = vmul.f32 %v633_v7, %v616_v1 }
 0x2ba   :  { %638 = vrot.lane.b32.xlu2 %v635_v8, %s1901_s26 }
 0x2c2   :  { %643 = vrot.lane.b32.xlu2 %v629_v5, %s1913_s2 }
 0x314   :  { %v639_v10 = vpop.permute.xlu2 %638 }
 0x315   :  { %v641_v11 = vsel %vm636_vm8, %v639_v10, 0.0 }
 0x316   :  { %v647_v12 = vpack.c.bf16 %v641_v11, %v641_v11 }
 0x318   :  { %1461 = vmatmul.msk.bf16.vlgmr.msra.gmra.mxu2 %vm581_vm9, %v647_v12 }
 0x31c   :  { %v644_v13 = vpop.permute.xlu2 %643 }
 0x31d   :  { %v646_v14 = vsel %vm636_vm8, %v644_v13, 0.0  ;;  %vm862_vm8 = vcmp.gt.s32.totalorder %v2119_v9, 3 }
 0x31e   :  { %v689_v15 = vrot.slane %v646_v14, 6 }
 0x320   :  { %690 = vrot.lane.b32.xlu1 %v689_v15, %s1912_s0 }
 0x392   :  { %v691_v37 = vpop.permute.xlu1 %690 }
 0x39b   :  { %v660_v16 = vpop.f32.mrf.mxu2 }
 0x39c   :  { %v665_v17 = vrot.slane %v660_v16, 6 }
 0x39e   :  { %v667_v18 = vadd.f32 %v665_v17, %v2106_v35 }
 0x3a0   :  { %1592 = vtanh.f32 %v667_v18  ;;  %v1462_v21 = vmul.f32 -1.442695, %v667_v18 }
 0x3a2   :  { %1594 = vpow2.f32 %v1462_v21 }
 0x3a3   :  { %v662_v19 = vpop.f32.mrf.mxu2 }
 0x3a6   :  { %v1593_v20 = vpop.eup %1592 }
 0x3a7   :  { %695 = vrot.lane.b32.xlu0 %v1593_v20, %s1912_s0 }
 0x3a8   :  { %v1595_v22 = vpop.eup %1594 }
 0x3a9   :  { %v671_v23 = vadd.f32 1.0, %v1595_v22 }
 0x3ab   :  { %1596 = vrcp.f32 %v671_v23  ;;  %v683_v29 = vand.u32 2147483648, %v671_v23  ;;  %vm677_vm11 = vweird.f32 %v671_v23  ;;  %v681_v31 = vand.u32 2147483647, %v671_v23 }
 0x3ad   :  { %v684_v33 = vor.u32 1.1754944e-38, %v683_v29  ;;  %vm682_vm13 = vcmp.eq.f32.partialorder %v681_v31, 8.507059e+37 }
 0x3b1   :  { %v1597_v24 = vpop.eup %1596 }
 0x3b2   :  { %v673_v25 = vmul.f32 %v1597_v24, %v671_v23  ;;  %vm678_vm10 = vweird.f32 %v1597_v24 }
 0x3b3   :  { %vm679_vm12 = vmor %vm677_vm11, %vm678_vm10 }
 0x3b4   :  { %v674_v26 = vsub.f32 1.0, %v673_v25 }
 0x3b6   :  { %v675_v27 = vmul.f32 %v1597_v24, %v674_v26  ;;  %v561_v26 = vpop.f32.mrf.mxu0 }
 0x3b8   :  { %v676_v28 = vadd.f32 %v1597_v24, %v675_v27 }
 0x3ba   :  { %v680_v32 = vsel %vm679_vm12, %v1597_v24, %v676_v28 }
 0x3bb   :  { %v685_v0 = vsel %vm682_vm13, %v684_v33, %v680_v32 }
 0x3bc   :  { %v693_v38 = vmul.f32 %v691_v37, %v685_v0 }
 0x419   :  { %v696_v34 = vpop.permute.xlu0 %695 }
 0x41a   :  { %v698_v36 = vmul.f32 %v696_v34, %v685_v0 }
 0x41c   :  { %700 = vrot.lane.b32.xlu2 %v698_v36, %s1912_s0 }
 0x476   :  { %v701_v39 = vpop.permute.xlu2 %700 }
 0x477   :  { %v703_v40 = vadd.f32 %v701_v39, %v693_v38 }
 0x479   :  { %1598 = vtanh.f32 %v703_v40  ;;  %v718_v41 = vrot.slane %v703_v40, 2 }
 0x47b   :  { %719 = vrot.lane.b32.xlu2 %v718_v41, %s1913_s2 }
 0x47f   :  { %v1599_v42 = vpop.eup %1598 }
 0x480   :  { %706 = vrot.lane.b32.xlu0 %v1599_v42, %s1912_s0 }
 0x4d5   :  { %v720_v46 = vpop.permute.xlu2 %719 }
 0x4d6   :  { %v722_v47 = vsel %vm710_vm14, %v720_v46, %v646_v14 }
 0x4d7   :  { %v765_v48 = vrot.slane %v722_v47, 4 }
 0x4f2   :  { %v707_v43 = vpop.permute.xlu0 %706 }
 0x4f3   :  { %v709_v44 = vmul.f32 %v707_v43, %v685_v0 }
 0x4f5   :  { %v712_v45 = vrot.slane %v709_v44, 2 }
 0x4f7   :  { %713 = vrot.lane.b32.xlu1 %v712_v45, %s1901_s26 }
 0x4ff   :  { %766 = vrot.lane.b32.xlu1 %v765_v48, %s1912_s0 }
 0x569   :  { %v714_v49 = vpop.permute.xlu1 %713 }
 0x56a   :  { %v716_v51 = vsel %vm710_vm14, %v714_v49, %v641_v11  ;;  %vm934_vm14 = vcmp.gt.s32.totalorder %v2119_v9, 4 }
 0x56b   :  { %v723_v52 = vpack.c.bf16 %v716_v51, %v716_v51 }
 0x56d   :  { %1463 = vmatmul.msk.bf16.vlgmr.msra.gmra.mxu3 %vm581_vm9, %v723_v52 }
 0x571   :  { %v767_v11 = vpop.permute.xlu1 %766 }
 0x5f0   :  { %v736_v53 = vpop.f32.mrf.mxu3 }
 0x5f1   :  { %v741_v54 = vrot.slane %v736_v53, 4 }
 0x5f3   :  { %v743_v55 = vadd.f32 %v741_v54, %v2106_v35 }
 0x5f5   :  { %1600 = vtanh.f32 %v743_v55  ;;  %v1464_v58 = vmul.f32 -1.442695, %v743_v55 }
 0x5f7   :  { %1602 = vpow2.f32 %v1464_v58 }
 0x5f8   :  { %v738_v56 = vpop.f32.mrf.mxu3 }
 0x5fb   :  { %v1601_v57 = vpop.eup %1600 }
 0x5fc   :  { %771 = vrot.lane.b32.xlu0 %v1601_v57, %s1912_s0 }
 0x5fd   :  { %v1603_v59 = vpop.eup %1602 }
 0x5fe   :  { %v747_v60 = vadd.f32 1.0, %v1603_v59 }
 0x600   :  { %1604 = vrcp.f32 %v747_v60  ;;  %v759_v3 = vand.u32 2147483648, %v747_v60  ;;  %vm753_vm0 = vweird.f32 %v747_v60  ;;  %v757_v4 = vand.u32 2147483647, %v747_v60 }
 0x602   :  { %v760_v6 = vor.u32 1.1754944e-38, %v759_v3  ;;  %vm758_vm2 = vcmp.eq.f32.partialorder %v757_v4, 8.507059e+37 }
 0x606   :  { %v1605_v61 = vpop.eup %1604 }
 0x607   :  { %v749_v62 = vmul.f32 %v1605_v61, %v747_v60  ;;  %vm754_vm15 = vweird.f32 %v1605_v61 }
 0x608   :  { %vm755_vm1 = vmor %vm753_vm0, %vm754_vm15 }
 0x609   :  { %v750_v63 = vsub.f32 1.0, %v749_v62  ;;  %v2156_v62 = vadd.f32 %v2103_v30, %v561_v26  ;;  %v1558_v26 = vld [vmem:[%s2250_s10 + $0x28] sm:$0xff] }
 0x60b   :  { %v751_v1 = vmul.f32 %v1605_v61, %v750_v63 }
 0x60d   :  { %v752_v2 = vadd.f32 %v1605_v61, %v751_v1 }
 0x60f   :  { %v756_v5 = vsel %vm755_vm1, %v1605_v61, %v752_v2 }
 0x610   :  { %v761_v8 = vsel %vm758_vm2, %v760_v6, %v756_v5 }
 0x611   :  { %v769_v12 = vmul.f32 %v767_v11, %v761_v8 }
 0x66e   :  { %v772_v7 = vpop.permute.xlu0 %771 }
 0x66f   :  { %v774_v10 = vmul.f32 %v772_v7, %v761_v8 }
 0x671   :  { %776 = vrot.lane.b32.xlu2 %v774_v10, %s1912_s0 }
 0x6cb   :  { %v777_v13 = vpop.permute.xlu2 %776 }
 0x6cc   :  { %v779_v14 = vadd.f32 %v777_v13, %v769_v12 }
 0x6ce   :  { %1606 = vtanh.f32 %v779_v14  ;;  %v794_v15 = vrot.slane %v779_v14, 4 }
 0x6d0   :  { %795 = vrot.lane.b32.xlu2 %v794_v15, %s1913_s2 }
 0x6d4   :  { %v1607_v16 = vpop.eup %1606 }
 0x6d5   :  { %782 = vrot.lane.b32.xlu0 %v1607_v16, %s1912_s0 }
 0x72a   :  { %v796_v20 = vpop.permute.xlu2 %795 }
 0x72b   :  { %v798_v21 = vsel %vm786_vm3, %v796_v20, %v722_v47 }
 0x72c   :  { %v841_v22 = vrot.slane %v798_v21, 2 }
 0x747   :  { %v783_v17 = vpop.permute.xlu0 %782 }
 0x748   :  { %v785_v18 = vmul.f32 %v783_v17, %v761_v8 }
 0x74a   :  { %v788_v19 = vrot.slane %v785_v18, 4 }
 0x74c   :  { %789 = vrot.lane.b32.xlu1 %v788_v19, %s1901_s26 }
 0x754   :  { %842 = vrot.lane.b32.xlu1 %v841_v22, %s1912_s0 }
 0x7be   :  { %v790_v23 = vpop.permute.xlu1 %789 }
 0x7bf   :  { %v792_v24 = vsel %vm786_vm3, %v790_v23, %v716_v51  ;;  %vm1008_vm3 = vcmp.gt.s32.totalorder %v2119_v9, 5 }
 0x7c0   :  { %v799_v25 = vpack.c.bf16 %v792_v24, %v792_v24 }
 0x7c2   :  { %1465 = vmatmul.msk.bf16.vlgmr.msrb.gmra.mxu0 %vm581_vm9, %v799_v25  ;;  %v1559_v25 = vld [vmem:[%s2250_s10 + $0x30] sm:$0xff] }
 0x7c6   :  { %v843_v47 = vpop.permute.xlu1 %842 }
 0x83f   :  { %v812_v27 = vpop.f32.mrf.mxu0 }
 0x840   :  { %v817_v28 = vrot.slane %v812_v27, 2 }
 0x842   :  { %v819_v29 = vadd.f32 %v817_v28, %v2106_v35 }
 0x844   :  { %1608 = vtanh.f32 %v819_v29  ;;  %v1466_v33 = vmul.f32 -1.442695, %v819_v29 }
 0x846   :  { %1610 = vpow2.f32 %v1466_v33  ;;  %v1557_v33 = vld [vmem:[%s2250_s10 + $0x20] sm:$0xff] }
 0x847   :  { %v814_v31 = vpop.f32.mrf.mxu0 }
 0x84a   :  { %v1609_v32 = vpop.eup %1608 }
 0x84b   :  { %847 = vrot.lane.b32.xlu0 %v1609_v32, %s1912_s0 }
 0x84c   :  { %v1611_v34 = vpop.eup %1610 }
 0x84d   :  { %v823_v0 = vadd.f32 1.0, %v1611_v34  ;;  %v1556_v34 = vld [vmem:[%s2250_s10 + $0x18] sm:$0xff] }
 0x84f   :  { %1612 = vrcp.f32 %v823_v0  ;;  %v835_v41 = vand.u32 2147483648, %v823_v0  ;;  %vm829_vm5 = vweird.f32 %v823_v0  ;;  %v833_v42 = vand.u32 2147483647, %v823_v0 }
 0x851   :  { %v836_v43 = vor.u32 1.1754944e-38, %v835_v41  ;;  %vm834_vm7 = vcmp.eq.f32.partialorder %v833_v42, 8.507059e+37  ;;  %v1167_v41 = vpack.c.bf16 %v2110_v50, %v2110_v50 }
 0x855   :  { %v1613_v36 = vpop.eup %1612 }
 0x856   :  { %v825_v37 = vmul.f32 %v1613_v36, %v823_v0  ;;  %vm830_vm4 = vweird.f32 %v1613_v36  ;;  %v1555_v0 = vld [vmem:[%s2250_s10 + $0x10] sm:$0xff] }
 0x857   :  { %vm831_vm6 = vmor %vm829_vm5, %vm830_vm4 }
 0x858   :  { %v826_v38 = vsub.f32 1.0, %v825_v37  ;;  %v1553_v37 = vld [vmem:[%s2250_s10] sm:$0xff] }
 0x85a   :  { %v827_v39 = vmul.f32 %v1613_v36, %v826_v38 }
 0x85c   :  { %v828_v40 = vadd.f32 %v1613_v36, %v827_v39 }
 0x85e   :  { %v832_v35 = vsel %vm831_vm6, %v1613_v36, %v828_v40  ;;  %v1554_v36 = vld [vmem:[%s2250_s10 + $0x8] sm:$0xff] }
 0x85f   :  { %v837_v45 = vsel %vm834_vm7, %v836_v43, %v832_v35 }
 0x860   :  { %v845_v48 = vmul.f32 %v843_v47, %v837_v45 }
 0x8bd   :  { %v848_v44 = vpop.permute.xlu0 %847 }
 0x8be   :  { %v850_v46 = vmul.f32 %v848_v44, %v837_v45 }
 0x8c0   :  { %852 = vrot.lane.b32.xlu2 %v850_v46, %s1912_s0 }
 0x91a   :  { %v853_v49 = vpop.permute.xlu2 %852 }
 0x91b   :  { %v855_v51 = vadd.f32 %v853_v49, %v845_v48 }
 0x91d   :  { %1614 = vtanh.f32 %v855_v51  ;;  %v870_v52 = vrot.slane %v855_v51, 6 }
 0x91f   :  { %871 = vrot.lane.b32.xlu2 %v870_v52, %s1913_s2 }
 0x923   :  { %v1615_v53 = vpop.eup %1614 }
 0x924   :  { %858 = vrot.lane.b32.xlu0 %v1615_v53, %s1912_s0 }
 0x979   :  { %v872_v57 = vpop.permute.xlu2 %871 }
 0x97a   :  { %v874_v58 = vsel %vm862_vm8, %v872_v57, %v798_v21 }
 0x996   :  { %v859_v54 = vpop.permute.xlu0 %858 }
 0x997   :  { %v861_v55 = vmul.f32 %v859_v54, %v837_v45 }
 0x999   :  { %v864_v56 = vrot.slane %v861_v55, 6 }
 0x99b   :  { %865 = vrot.lane.b32.xlu1 %v864_v56, %s1901_s26 }
 0x9a3   :  { %914 = vrot.lane.b32.xlu1 %v874_v58, %s1912_s0 }
 0xa0d   :  { %v866_v59 = vpop.permute.xlu1 %865 }
 0xa0e   :  { %v2150_v60 = vsel %vm862_vm8, %v866_v59, %v792_v24  ;;  %v1560_v24 = vld [vmem:[%s2250_s10 + $0x38] sm:$0xff]  ;;  %vm1084_vm8 = vcmp.gt.s32.totalorder %v2119_v9, 6 }
 0xa0f   :  { %v875_v61 = vpack.c.bf16 %v2150_v60, %v2150_v60  ;;  %1265 = vmatpush.bf16.msra.mxu2 %v1560_v24 }
 0xa11   :  { %1467 = vmatmul.msk.bf16.vlgmr.msrb.gmra.mxu1 %vm581_vm9, %v875_v61 }
 0xa13   :  { %1266 = vmatpush.bf16.msra.mxu2 %v1559_v25 }
 0xa15   :  { %v915_v19 = vpop.permute.xlu1 %914 }
 0xa17   :  { %1267 = vmatpush.bf16.msra.mxu2 %v1558_v26 }
 0xa1b   :  { %1268 = vmatpush.bf16.msra.mxu2 %v1557_v33 }
 0xa1f   :  { %1269 = vmatpush.bf16.msra.mxu2 %v1556_v34 }
 0xa23   :  { %1270 = vmatpush.bf16.msra.mxu2 %v1555_v0 }
 0xa27   :  { %1271 = vmatpush.bf16.msra.mxu2 %v1554_v36 }
 0xa2b   :  { %1272 = vmatpush.bf16.msra.mxu2 %v1553_v37 }
 0xa8e   :  { %v888_v63 = vpop.f32.mrf.mxu1 }
 0xa8f   :  { %v892_v1 = vadd.f32 %v888_v63, %v2156_v62 }
 0xa91   :  { %1616 = vtanh.f32 %v892_v1  ;;  %v1468_v4 = vmul.f32 -1.442695, %v892_v1 }
 0xa93   :  { %1618 = vpow2.f32 %v1468_v4 }
 0xa96   :  { %v890_v2 = vpop.f32.mrf.mxu1 }
 0xa97   :  { %v1617_v3 = vpop.eup %1616 }
 0xa98   :  { %919 = vrot.lane.b32.xlu0 %v1617_v3, %s1912_s0 }
 0xa99   :  { %v1619_v5 = vpop.eup %1618 }
 0xa9a   :  { %v896_v6 = vadd.f32 1.0, %v1619_v5 }
 0xa9c   :  { %1620 = vrcp.f32 %v896_v6  ;;  %v908_v30 = vand.u32 2147483648, %v896_v6  ;;  %vm902_vm11 = vweird.f32 %v896_v6  ;;  %v906_v13 = vand.u32 2147483647, %v896_v6 }
 0xa9e   :  { %v909_v15 = vor.u32 1.1754944e-38, %v908_v30  ;;  %vm907_vm13 = vcmp.eq.f32.partialorder %v906_v13, 8.507059e+37 }
 0xaa2   :  { %v1621_v7 = vpop.eup %1620 }
 0xaa3   :  { %v898_v8 = vmul.f32 %v1621_v7, %v896_v6  ;;  %vm903_vm10 = vweird.f32 %v1621_v7 }
 0xaa4   :  { %vm904_vm12 = vmor %vm902_vm11, %vm903_vm10 }
 0xaa5   :  { %v899_v10 = vsub.f32 1.0, %v898_v8 }
 0xaa7   :  { %v900_v11 = vmul.f32 %v1621_v7, %v899_v10 }
 0xaa9   :  { %v901_v12 = vadd.f32 %v1621_v7, %v900_v11 }
 0xaab   :  { %v905_v14 = vsel %vm904_vm12, %v1621_v7, %v901_v12 }
 0xaac   :  { %v910_v17 = vsel %vm907_vm13, %v909_v15, %v905_v14 }
 0xaad   :  { %v917_v20 = vmul.f32 %v915_v19, %v910_v17 }
 0xb0a   :  { %v920_v16 = vpop.permute.xlu0 %919 }
 0xb0b   :  { %v922_v18 = vmul.f32 %v920_v16, %v910_v17 }
 0xb0d   :  { %924 = vrot.lane.b32.xlu2 %v922_v18, %s1912_s0 }
 0xb67   :  { %v925_v21 = vpop.permute.xlu2 %924 }
 0xb68   :  { %v927_v22 = vadd.f32 %v925_v21, %v917_v20 }
 0xb6a   :  { %1622 = vtanh.f32 %v927_v22  ;;  %941 = vrot.lane.b32.xlu2 %v927_v22, %s1913_s2 }
 0xb70   :  { %v1623_v23 = vpop.eup %1622 }
 0xb71   :  { %930 = vrot.lane.b32.xlu0 %v1623_v23, %s1912_s0 }
 0xbc4   :  { %v942_v29 = vpop.permute.xlu2 %941 }
 0xbc5   :  { %v2176_v31 = vsel %vm934_vm14, %v942_v29, %v874_v58 }
 0xbc6   :  { %v987_v32 = vrot.slane %v2176_v31, 6 }
 0xbe3   :  { %v931_v27 = vpop.permute.xlu0 %930 }
 0xbe4   :  { %v933_v28 = vmul.f32 %v931_v27, %v910_v17 }
 0xbe6   :  { %936 = vrot.lane.b32.xlu1 %v933_v28, %s1901_s26 }
 0xbee   :  { %988 = vrot.lane.b32.xlu1 %v987_v32, %s1912_s0 }
 0xc58   :  { %v937_v38 = vpop.permute.xlu1 %936 }
 0xc59   :  { %v939_v39 = vsel %vm934_vm14, %v937_v38, %v2150_v60  ;;  %vm1160_vm14 = vcmp.gt.s32.totalorder %v2119_v9, 7  ;;  %v1583_v9 = vld [vmem:[%s2254_s14] ss:$0 sm:$0xff] }
 0xc5a   :  { %v945_v40 = vpack.c.bf16 %v939_v39, %v939_v39 }
 0xc5c   :  { %1469 = vmatmul.msk.bf16.vlgmr.msrb.gmra.mxu2 %vm581_vm9, %v945_v40 }
 0xc60   :  { %v989_v1 = vpop.permute.xlu1 %988 }
 0xc6c   :  { %1273 = vmatmul.bf16.vlgmr.msra.gmra.mxu2 %v1167_v41 }
 0xcdf   :  { %v958_v42 = vpop.f32.mrf.mxu2 }
 0xce0   :  { %v963_v35 = vrot.slane %v958_v42, 6 }
 0xce2   :  { %v965_v43 = vadd.f32 %v963_v35, %v2156_v62 }
 0xce4   :  { %1624 = vtanh.f32 %v965_v43  ;;  %v1470_v48 = vmul.f32 -1.442695, %v965_v43 }
 0xce6   :  { %1626 = vpow2.f32 %v1470_v48 }
 0xce7   :  { %v960_v44 = vpop.f32.mrf.mxu2 }
 0xcea   :  { %v1625_v45 = vpop.eup %1624 }
 0xceb   :  { %993 = vrot.lane.b32.xlu0 %v1625_v45, %s1912_s0 }
 0xcec   :  { %v1627_v49 = vpop.eup %1626 }
 0xced   :  { %v969_v51 = vadd.f32 1.0, %v1627_v49 }
 0xcef   :  { %v2203_v46 = vpop.f32.mrf.mxu2  ;;  %1628 = vrcp.f32 %v969_v51  ;;  %v981_v56 = vand.u32 2147483648, %v969_v51  ;;  %vm975_vm0 = vweird.f32 %v969_v51  ;;  %v979_v57 = vand.u32 2147483647, %v969_v51 }
 0xcf1   :  { %v982_v59 = vor.u32 1.1754944e-38, %v981_v56  ;;  %vm980_vm2 = vcmp.eq.f32.partialorder %v979_v57, 8.507059e+37 }
 0xcf5   :  { %v1629_v52 = vpop.eup %1628 }
 0xcf6   :  { %v971_v50 = vmul.f32 %v1629_v52, %v969_v51  ;;  %vm976_vm15 = vweird.f32 %v1629_v52 }
 0xcf7   :  { %v1276_v47 = vpop.f32.mrf.mxu2  ;;  %vm977_vm1 = vmor %vm975_vm0, %vm976_vm15 }
 0xcf8   :  { %v972_v53 = vsub.f32 1.0, %v971_v50 }
 0xcfa   :  { %v973_v54 = vmul.f32 %v1629_v52, %v972_v53 }
 0xcfc   :  { %v974_v55 = vadd.f32 %v1629_v52, %v973_v54 }
 0xcfe   :  { %v978_v58 = vsel %vm977_vm1, %v1629_v52, %v974_v55 }
 0xcff   :  { %v983_v61 = vsel %vm980_vm2, %v982_v59, %v978_v58 }
 0xd00   :  { %v991_v2 = vmul.f32 %v989_v1, %v983_v61 }
 0xd5d   :  { %v994_v60 = vpop.permute.xlu0 %993 }
 0xd5e   :  { %v996_v63 = vmul.f32 %v994_v60, %v983_v61 }
 0xd60   :  { %998 = vrot.lane.b32.xlu2 %v996_v63, %s1912_s0 }
 0xdba   :  { %v999_v3 = vpop.permute.xlu2 %998 }
 0xdbb   :  { %v1001_v4 = vadd.f32 %v999_v3, %v991_v2 }
 0xdbd   :  { %1630 = vtanh.f32 %v1001_v4  ;;  %v1016_v5 = vrot.slane %v1001_v4, 2 }
 0xdbf   :  { %1017 = vrot.lane.b32.xlu2 %v1016_v5, %s1913_s2 }
 0xdc3   :  { %v1631_v6 = vpop.eup %1630 }
 0xdc4   :  { %1004 = vrot.lane.b32.xlu0 %v1631_v6, %s1912_s0 }
 0xe19   :  { %v1018_v11 = vpop.permute.xlu2 %1017 }
 0xe1a   :  { %v1020_v12 = vsel %vm1008_vm3, %v1018_v11, %v2176_v31 }
 0xe1b   :  { %v1063_v30 = vrot.slane %v1020_v12, 4 }
 0xe36   :  { %v1005_v7 = vpop.permute.xlu0 %1004 }
 0xe37   :  { %v1007_v8 = vmul.f32 %v1005_v7, %v983_v61 }
 0xe39   :  { %v1010_v10 = vrot.slane %v1007_v8, 2 }
 0xe3b   :  { %1011 = vrot.lane.b32.xlu1 %v1010_v10, %s1901_s26 }
 0xe43   :  { %1064 = vrot.lane.b32.xlu1 %v1063_v30, %s1912_s0 }
 0xead   :  { %v1012_v13 = vpop.permute.xlu1 %1011 }
 0xeae   :  { %v1014_v14 = vsel %vm1008_vm3, %v1012_v13, %v939_v39 }
 0xeaf   :  { %v1021_v15 = vpack.c.bf16 %v1014_v14, %v1014_v14 }
 0xeb1   :  { %1471 = vmatmul.msk.bf16.vlgmr.msrb.gmra.mxu3 %vm581_vm9, %v1021_v15  ;;  %v1561_v15 = vld [vmem:[#allocation14] sm:$0xff] }
 0xeb5   :  { %v1065_v37 = vpop.permute.xlu1 %1064 }
 0xf34   :  { %v1034_v16 = vpop.f32.mrf.mxu3 }
 0xf35   :  { %v1039_v17 = vrot.slane %v1034_v16, 4 }
 0xf37   :  { %v1041_v18 = vadd.f32 %v1039_v17, %v2156_v62 }
 0xf39   :  { %1632 = vtanh.f32 %v1041_v18  ;;  %v1472_v21 = vmul.f32 -1.442695, %v1041_v18 }
 0xf3b   :  { %1634 = vpow2.f32 %v1472_v21 }
 0xf3c   :  { %v1036_v19 = vpop.f32.mrf.mxu3 }
 0xf3d   :  { %v1564_v19 = vld [vmem:[#allocation16 + $0x8] sm:$0xff] }
 0xf3e   :  { %1314 = vmatpush.bf16.msra.mxu3 %v1564_v19 }
 0xf3f   :  { %v1633_v20 = vpop.eup %1632 }
 0xf40   :  { %1069 = vrot.lane.b32.xlu0 %v1633_v20, %s1912_s0 }
 0xf41   :  { %v1635_v22 = vpop.eup %1634 }
 0xf42   :  { %v1045_v23 = vadd.f32 1.0, %v1635_v22 }
 0xf44   :  { %1636 = vrcp.f32 %v1045_v23  ;;  %v1057_v29 = vand.u32 2147483648, %v1045_v23  ;;  %vm1051_vm5 = vweird.f32 %v1045_v23  ;;  %v1055_v31 = vand.u32 2147483647, %v1045_v23 }
 0xf46   :  { %v1058_v33 = vor.u32 1.1754944e-38, %v1057_v29  ;;  %vm1056_vm7 = vcmp.eq.f32.partialorder %v1055_v31, 8.507059e+37 }
 0xf4a   :  { %v1637_v24 = vpop.eup %1636 }
 0xf4b   :  { %v1047_v25 = vmul.f32 %v1637_v24, %v1045_v23  ;;  %vm1052_vm4 = vweird.f32 %v1637_v24  ;;  %v1563_v23 = vld [vmem:[#allocation16] sm:$0xff] }
 0xf4c   :  { %vm1053_vm6 = vmor %vm1051_vm5, %vm1052_vm4  ;;  %1315 = vmatpush.bf16.msra.mxu3 %v1563_v23 }
 0xf4d   :  { %v1048_v26 = vsub.f32 1.0, %v1047_v25 }
 0xf4f   :  { %v1049_v27 = vmul.f32 %v1637_v24, %v1048_v26 }
 0xf51   :  { %v1050_v28 = vadd.f32 %v1637_v24, %v1049_v27 }
 0xf53   :  { %v1054_v32 = vsel %vm1053_vm6, %v1637_v24, %v1050_v28  ;;  %v1582_v24 = vld [vmem:[%s2252_s12] ss:$0 sm:$0xff] }
 0xf54   :  { %v1059_v0 = vsel %vm1056_vm7, %v1058_v33, %v1054_v32 }
 0xf55   :  { %v1067_v38 = vmul.f32 %v1065_v37, %v1059_v0 }
 0xfb2   :  { %v1070_v34 = vpop.permute.xlu0 %1069 }
 0xfb3   :  { %v1072_v36 = vmul.f32 %v1070_v34, %v1059_v0 }
 0xfb5   :  { %1074 = vrot.lane.b32.xlu2 %v1072_v36, %s1912_s0 }
0x100f   :  { %v1075_v39 = vpop.permute.xlu2 %1074 }
0x1010   :  { %v1077_v40 = vadd.f32 %v1075_v39, %v1067_v38 }
0x1012   :  { %1638 = vtanh.f32 %v1077_v40  ;;  %v1092_v41 = vrot.slane %v1077_v40, 4 }
0x1014   :  { %1093 = vrot.lane.b32.xlu2 %v1092_v41, %s1913_s2 }
0x1018   :  { %v1639_v42 = vpop.eup %1638 }
0x1019   :  { %1080 = vrot.lane.b32.xlu0 %v1639_v42, %s1912_s0 }
0x106e   :  { %v1094_v45 = vpop.permute.xlu2 %1093 }
0x106f   :  { %v1096_v47 = vsel %vm1084_vm8, %v1094_v45, %v1020_v12 }
0x1070   :  { %v1139_v48 = vrot.slane %v1096_v47, 2 }
0x108b   :  { %v1081_v35 = vpop.permute.xlu0 %1080 }
0x108c   :  { %v1083_v43 = vmul.f32 %v1081_v35, %v1059_v0 }
0x108e   :  { %v1086_v44 = vrot.slane %v1083_v43, 4 }
0x1090   :  { %1087 = vrot.lane.b32.xlu1 %v1086_v44, %s1901_s26 }
0x1098   :  { %1140 = vrot.lane.b32.xlu1 %v1139_v48, %s1912_s0 }
0x1102   :  { %v1088_v49 = vpop.permute.xlu1 %1087 }
0x1103   :  { %v1090_v51 = vsel %vm1084_vm8, %v1088_v49, %v1014_v14  ;;  %v1562_v14 = vld [vmem:[#allocation14 + $0x8] sm:$0xff] }
0x1104   :  { %v1097_v52 = vpack.c.bf16 %v1090_v51, %v1090_v51  ;;  %1210 = vmatpush.bf16.msra.mxu1 %v1562_v14 }
0x1106   :  { %1473 = vmatmul.msk.bf16.vlgmr.msra.gmra.mxu0 %vm581_vm9, %v1097_v52 }
0x1108   :  { %1211 = vmatpush.bf16.msra.mxu1 %v1561_v15 }
0x110a   :  { %v1141_v10 = vpop.permute.xlu1 %1140 }
0x1183   :  { %v1110_v50 = vpop.f32.mrf.mxu0 }
0x1184   :  { %v1115_v53 = vrot.slane %v1110_v50, 2 }
0x1186   :  { %v1117_v54 = vadd.f32 %v1115_v53, %v2156_v62 }
0x1188   :  { %1640 = vtanh.f32 %v1117_v54  ;;  %v1474_v57 = vmul.f32 -1.442695, %v1117_v54 }
0x118a   :  { %1642 = vpow2.f32 %v1474_v57 }
0x118b   :  { %v1112_v55 = vpop.f32.mrf.mxu0 }
0x118e   :  { %v1641_v56 = vpop.eup %1640 }
0x118f   :  { %1145 = vrot.lane.b32.xlu0 %v1641_v56, %s1912_s0 }
0x1190   :  { %v1643_v58 = vpop.eup %1642 }
0x1191   :  { %v1121_v59 = vadd.f32 1.0, %v1643_v58 }
0x1193   :  { %1644 = vrcp.f32 %v1121_v59  ;;  %v1133_v3 = vand.u32 2147483648, %v1121_v59  ;;  %vm1127_vm11 = vweird.f32 %v1121_v59  ;;  %v1131_v4 = vand.u32 2147483647, %v1121_v59 }
0x1195   :  { %v1134_v5 = vor.u32 1.1754944e-38, %v1133_v3  ;;  %vm1132_vm13 = vcmp.eq.f32.partialorder %v1131_v4, 8.507059e+37 }
0x1199   :  { %v1645_v60 = vpop.eup %1644 }
0x119a   :  { %v1123_v61 = vmul.f32 %v1645_v60, %v1121_v59  ;;  %vm1128_vm10 = vweird.f32 %v1645_v60 }
0x119b   :  { %vm1129_vm12 = vmor %vm1127_vm11, %vm1128_vm10 }
0x119c   :  { %v1124_v63 = vsub.f32 1.0, %v1123_v61 }
0x119e   :  { %v1125_v1 = vmul.f32 %v1645_v60, %v1124_v63 }
0x11a0   :  { %v1126_v2 = vadd.f32 %v1645_v60, %v1125_v1 }
0x11a2   :  { %v1130_v62 = vsel %vm1129_vm12, %v1645_v60, %v1126_v2 }
0x11a3   :  { %v1135_v7 = vsel %vm1132_vm13, %v1134_v5, %v1130_v62 }
0x11a4   :  { %v1143_v11 = vmul.f32 %v1141_v10, %v1135_v7 }
0x1201   :  { %v1146_v6 = vpop.permute.xlu0 %1145 }
0x1202   :  { %v1148_v8 = vmul.f32 %v1146_v6, %v1135_v7 }
0x1204   :  { %1150 = vrot.lane.b32.xlu2 %v1148_v8, %s1912_s0 }
0x125e   :  { %v1151_v12 = vpop.permute.xlu2 %1150 }
0x125f   :  { %v1153_v30 = vadd.f32 %v1151_v12, %v1143_v11 }
0x1261   :  { %1646 = vtanh.f32 %v1153_v30 }
0x1267   :  { %v1647_v13 = vpop.eup %1646 }
0x1268   :  { %1156 = vrot.lane.b32.xlu0 %v1647_v13, %s1912_s0  ;;  %s1329_s0 = sshll.u32 %s2255_s15, 4  ;;  %s1330_s0 = int_to_ptr.hbm [resolvable:$true] %s1329_s0 }
0x12da   :  { %v1157_v16 = vpop.permute.xlu0 %1156 }
0x12db   :  { %v1159_v17 = vmul.f32 %v1157_v16, %v1135_v7 }
0x12dd   :  { %v1162_v18 = vrot.slane %v1159_v17, 6 }
0x12df   :  { %1163 = vrot.lane.b32.xlu1 %v1162_v18, %s1901_s26 }
0x1351   :  { %v1164_v20 = vpop.permute.xlu1 %1163 }
0x1352   :  { %v1166_v21 = vsel %vm1160_vm14, %v1164_v20, %v1090_v51 }
0x1353   :  { %v1184_v22 = vpack.c.bf16 %v1166_v21, %v1166_v21 }
0x1355   :  { %1483 = vmatmul.msk.bf16.vlgmr.msra.gmra.mxu1 %vm581_vm9, %v1184_v22 }
0x13d2   :  { %v1213_v25 = vpop.f32.mrf.mxu1 }
0x13d3   :  { %v1275_v26 = vadd.f32 %v2203_v46, %v1213_v25 }
0x13d5   :  { %v1282_v27 = vadd.f32 %v1582_v24, %v1275_v26 }
0x13d7   :  { %v1283_v28 = vmax.f32 %v1282_v27, 0.0 }
0x13d9   :  { %v1284_v29 = vpack.c.bf16 %v1283_v28, %v1283_v28 }
0x13da   :  { %v1215_v31 = vpop.f32.mrf.mxu1 }
0x13db   :  { %1524 = vmatmul.msk.bf16.vlgmr.msra.gmra.mxu3 %vm581_vm9, %v1284_v29 }
0x145e   :  { %v1317_v32 = vpop.f32.mrf.mxu3 }
0x145f   :  { %v1318_v33 = vadd.f32 %v1583_v9, %v1317_v32 }
0x1461   :  { %1321 = vst [vmem:[#allocation17] sm:$0x3] %v1318_v33 }
0x1462   :  { %1332 = dma.vmem_to_hbm [thread:$0]  %s1328_s18, 32, %s1330_s0, [#allocation4]  }
0x1466   :  { %v1319_v46 = vpop.f32.mrf.mxu3 }
0x1467   :  { %1898 = dma.done.wait [#allocation4], 32  }
0x1468   :  { %1899 = vsyncadd [#allocation4], 4294967264 }
0x1469   :  { %1337 = vsyncpa [#allocation3], 1 }
0x146a   :  { %1338 = vsyncpa [#allocation6], 1 }
0x146b   :  { %1339 = vsyncpa [#allocation9], 1 }
0x146c   :  { %1340 = vsyncpa [#allocation12], 1 }
0x146d   :  { %1341 = vsyncpa [#allocation15], 1 }
0x146e   :  { %1342 = vsyncpa [#allocation4], 1 }

</bundles_post_ra>
